<compile_context>
chip_gen: v5e
topology: v5e:2x2
jax: 0.10.0
libtpu: 0.0.40
codegen_flags: <defaults>
</compile_context>

<pallas_src>
import math

import jax
import jax.numpy as jnp
from jax import lax
from jax.experimental import pallas as pl
from jax.experimental.pallas import tpu as pltpu

D_CONV = 4          # Mamba default depthwise conv width
SCAN_CHUNK = 8      # timesteps resolved per fori_loop iteration (static unroll)


def _round_up(x, m):
    return ((x + m - 1) // m) * m


def _xp_layout(d_inner, d_state):
    """Column layout of the fused x_proj output: [dt_pre(d_inner) | pad | B C]."""
    col_bc = _round_up(d_inner, 128)              # B|C block starts on a 128-lane boundary
    xp_cols = col_bc + _round_up(2 * d_state, 128)
    return col_bc, xp_cols


def _layernorm(h, g, b, eps=1e-5):
    mu = jnp.mean(h, axis=-1, keepdims=True)
    var = jnp.mean((h - mu) ** 2, axis=-1, keepdims=True)
    return (h - mu) * lax.rsqrt(var + eps) * g + b


# ----------------------------------------------------------------------------
# Fused kernel: embed + n_layers Mamba blocks + head, for one batch row.
# ----------------------------------------------------------------------------
def s6_fused_kernel(
    # inputs -------------------------------------------------------------
    x_ref,                                      # (L, d_input) raw input row
    w_emb_ref, b_emb_ref, pn_g_ref, pn_b_ref,   # embed Linear + post LayerNorm
    w_in_ref,                                   # (d_model, 2*d_inner)  bf16
    conv_w_ref, conv_b_ref,                     # (d_conv, d_inner), (1, d_inner)
    w_xp_ref,                                   # (d_inner, xp_cols)    bf16 fused [dtp|B|C]
    dt_b_ref,                                   # (1, d_inner)
    a_log_ref,                                  # (d_state, d_inner)
    d_ref,                                      # (1, d_inner)
    w_out_ref,                                  # (d_inner, d_model)    bf16
    ln_g_ref, ln_b_ref,                         # (1, d_model)
    w_head_ref, b_head_ref,                     # (d_model, d_out), (1, d_out)
    # output -------------------------------------------------------------
    o_ref,                                      # (1, d_out) logits for batch b
    # scratch ------------------------------------------------------------
    h_s,                                        # (L, d_model) resident activation
    delta_s, u_s, y_s,                          # (L, d_inner)
    bcT_s,                                      # (n_chunks, 2*d_state, tc) transposed B|C
):
    layer = pl.program_id(1)
    n_layers = pl.num_programs(1)

    L, d_inner = delta_s.shape
    n_chunks, two_ds, tc = bcT_s.shape
    d_state = two_ds // 2
    d_conv = conv_w_ref.shape[0]
    col_bc, _ = _xp_layout(d_inner, d_state)

    # ---- layer 0: embedding Linear + post LayerNorm into resident buffer ----
    @pl.when(layer == 0)
    def _():
        xe = x_ref[...].astype(jnp.float32)
        h0 = jnp.dot(xe, w_emb_ref[...], preferred_element_type=jnp.float32) + b_emb_ref[...]
        h_s[...] = _layernorm(h0, pn_g_ref[...], pn_b_ref[...])

    x = h_s[...]                                           # (L, d_model)

    # ---- in_proj: one fused bf16 matmul, slice x|z halves -------------------
    xz = jnp.dot(x.astype(jnp.bfloat16), w_in_ref[...],
                 preferred_element_type=jnp.float32)        # (L, 2*d_inner)
    xin = xz[:, :d_inner]
    z = xz[:, d_inner:]

    # ---- causal depthwise conv1d via rolled + masked adds -------------------
    cw = conv_w_ref[...]                                    # (d_conv, d_inner)
    row_idx = lax.broadcasted_iota(jnp.int32, (L, 1), 0)
    conv = xin * cw[d_conv - 1:d_conv, :] + conv_b_ref[...]  # shift-0 tap + bias
    for k in range(d_conv - 1):
        s = d_conv - 1 - k                                  # shift 3, 2, 1
        shifted = pltpu.roll(xin, shift=s, axis=0)           # row t <- row t - s
        shifted = jnp.where(row_idx >= s, shifted, 0.0)      # causal zero padding
        conv = conv + shifted * cw[k:k + 1, :]
    u = jax.nn.silu(conv)                                    # (L, d_inner)

    # ---- fused x_proj (dt_proj pre-composed on host) + softplus --------------
    xp = jnp.dot(u.astype(jnp.bfloat16), w_xp_ref[...],
                 preferred_element_type=jnp.float32)         # (L, xp_cols)
    delta = jax.nn.softplus(xp[:, :d_inner] + dt_b_ref[...]) # (L, d_inner)
    bc = xp[:, col_bc:col_bc + 2 * d_state]                  # (L, 2*d_state) lane-aligned

    # ---- transpose [B|C] -> (2*d_state, L) with ONE MXU op per layer ---------
    # (transpose-by-identity NT matmul: eye @ bc^T; keeps d_state on sublanes so
    #  the scan's per-step broadcasts never touch the MXU)
    eye = (lax.broadcasted_iota(jnp.int32, (two_ds, two_ds), 0) ==
           lax.broadcasted_iota(jnp.int32, (two_ds, two_ds), 1)).astype(jnp.float32)
    bc_T = lax.dot_general(eye, bc, dimension_numbers=(((1,), (1,)), ((), ())),
                           preferred_element_type=jnp.float32)   # (2*d_state, L)
    for j in range(n_chunks):                                # static staging loop
        bcT_s[j] = bc_T[:, j * tc:(j + 1) * tc]

    # stage scan inputs once so the chunk loop takes aligned sublane slices
    delta_s[...] = delta
    u_s[...] = u

    a_neg = -jnp.exp(a_log_ref[...])                         # (d_state, d_inner)

    # ---- selective scan: VPU/XLU-only inner step, chunked over time ----------
    def chunk_body(j, h):                                    # h: (d_state, d_inner)
        base = pl.multiple_of(j * tc, tc)
        dlt_c = delta_s[pl.ds(base, tc), :]                  # (tc, d_inner)
        du_c = dlt_c * u_s[pl.ds(base, tc), :]               # (tc, d_inner)
        bc_cols = bcT_s[j]                                   # (2*d_state, tc)
        b_cols = bc_cols[:d_state, :]
        c_cols = bc_cols[d_state:, :]
        # hoisted EUP work: exp for the whole chunk, off the serial h chain
        da_c = jnp.exp(dlt_c[:, None, :] * a_neg[None, :, :])  # (tc, d_state, d_inner)
        y_rows = []
        for k in range(tc):                                  # static unroll in-chunk
            h = da_c[k] * h + b_cols[:, k:k + 1] * du_c[k:k + 1, :]   # VPU FMA
            y_rows.append(jnp.sum(c_cols[:, k:k + 1] * h,             # VPU mul +
                                  axis=0, keepdims=True))             # XLU sublane reduce
        # one aligned, unmasked (tc, d_inner) store per chunk
        y_s[pl.ds(base, tc), :] = jnp.concatenate(y_rows, axis=0)
        return h

    lax.fori_loop(0, n_chunks, chunk_body,
                  jnp.zeros((d_state, d_inner), jnp.float32))

    # ---- skip term, gate, out_proj, residual + LayerNorm ----------------------
    y = y_s[...] + d_ref[...] * u_s[...]
    y = y * jax.nn.silu(z)
    out = jnp.dot(y.astype(jnp.bfloat16), w_out_ref[...],
                  preferred_element_type=jnp.float32)        # (L, d_model)
    h_new = _layernorm(x + out, ln_g_ref[...], ln_b_ref[...])
    h_s[...] = h_new                                         # stays resident in VMEM

    # ---- classifier head fused into the final layer step ----------------------
    @pl.when(layer == n_layers - 1)
    def _():
        hm = jnp.mean(h_new, axis=0, keepdims=True)          # (1, d_model)
        o_ref[...] = (jnp.dot(hm, w_head_ref[...], preferred_element_type=jnp.float32)
                      + b_head_ref[...])


# ----------------------------------------------------------------------------
# Wrapper (single pallas_call for the whole network)
# ----------------------------------------------------------------------------
_EMBED_NAMES = ("w_emb_T", "b_emb", "pn_g", "pn_b")
_LAYER_NAMES = ("w_in_T", "conv_w", "conv_b", "w_xp_fused", "dt_bias",
                "a_log_T", "d_row", "w_out_T", "ln_g", "ln_b")
_HEAD_NAMES = ("w_head_T", "b_head")


def s6_ssm_forward(x_nchw, params):
    B, C, H, W = x_nchw.shape
    L = H * W
    x = x_nchw.reshape(B, L, C)                  # == PyTorch x.view(B, H*W, C)

    n_layers = params["w_in_T"].shape[0]
    d_model = params["w_emb_T"].shape[1]
    d_inner = params["w_in_T"].shape[2] // 2
    d_state = params["a_log_T"].shape[1]
    d_out = params["w_head_T"].shape[1]

    tc = math.gcd(L, SCAN_CHUNK)                 # static chunk length
    n_chunks = L // tc

    def full_spec(a):                             # shared (non-stacked) weight
        zeros = (0,) * a.ndim
        return pl.BlockSpec(a.shape, lambda b, l, _z=zeros: _z)

    def stacked_spec(a):                          # per-layer weight, indexed by l
        tail = (0,) * (a.ndim - 1)
        return pl.BlockSpec((None,) + a.shape[1:], lambda b, l, _t=tail: (l,) + _t)

    args = [x]
    in_specs = [pl.BlockSpec((None, L, C), lambda b, l: (b, 0, 0))]
    for n in _EMBED_NAMES:
        args.append(params[n]); in_specs.append(full_spec(params[n]))
    for n in _LAYER_NAMES:
        args.append(params[n]); in_specs.append(stacked_spec(params[n]))
    for n in _HEAD_NAMES:
        args.append(params[n]); in_specs.append(full_spec(params[n]))

    logits = pl.pallas_call(
        s6_fused_kernel,
        out_shape=jax.ShapeDtypeStruct((B, 1, d_out), jnp.float32),
        grid=(B, n_layers),                       # layer axis innermost
        in_specs=in_specs,
        out_specs=pl.BlockSpec((None, 1, d_out), lambda b, l: (b, 0, 0)),
        scratch_shapes=[
            pltpu.VMEM((L, d_model), jnp.float32),          # resident activation h
            pltpu.VMEM((L, d_inner), jnp.float32),          # delta
            pltpu.VMEM((L, d_inner), jnp.float32),          # u (conv+SiLU output)
            pltpu.VMEM((L, d_inner), jnp.float32),          # scan output y
            pltpu.VMEM((n_chunks, 2 * d_state, tc), jnp.float32),  # transposed B|C chunks
        ],
        compiler_params=pltpu.CompilerParams(
            dimension_semantics=("parallel", "arbitrary"),
            # 48 MiB fits v7x's 64 MiB/TC with headroom; raise toward 100 MiB on
            # v5e/v6e (128 MiB physical) when scaling L / d_inner up.
            vmem_limit_bytes=48 * 1024 * 1024,
        ),
    )(*args)
    return logits.reshape(B, d_out)


# ----------------------------------------------------------------------------
# Deterministic synthetic parameters (shapes follow the PyTorch module)
# ----------------------------------------------------------------------------
def init_params(key, d_input, d_model, d_state, d_output, n_layers):
    d_inner = 2 * d_model
    dt_rank = math.ceil(d_model / 16)
    col_bc, xp_cols = _xp_layout(d_inner, d_state)
    keys = iter(jax.random.split(key, 16 * n_layers + 8))

    def nrm(shape, scale):
        return scale * jax.random.normal(next(keys), shape, jnp.float32)

    params = {
        "w_emb_T": nrm((d_input, d_model), 0.2),
        "b_emb": nrm((1, d_model), 0.1),
        "pn_g": jnp.ones((1, d_model), jnp.float32),
        "pn_b": jnp.zeros((1, d_model), jnp.float32),
        "w_head_T": nrm((d_model, d_output), 0.1),
        "b_head": jnp.zeros((1, d_output), jnp.float32),
    }

    per_layer = {n: [] for n in _LAYER_NAMES}
    for _ in range(n_layers):
        A = jnp.tile(jnp.arange(1, d_state + 1, dtype=jnp.float32)[:, None], (1, d_inner))
        # x_proj split into dt / B / C parts, dt_proj folded in on the host:
        w_xp_dt = nrm((d_inner, dt_rank), 0.1)
        w_xp_b = nrm((d_inner, d_state), 0.1)
        w_xp_c = nrm((d_inner, d_state), 0.1)
        w_dt = nrm((dt_rank, d_inner), 0.3)
        fused = jnp.zeros((d_inner, xp_cols), jnp.float32)
        fused = fused.at[:, :d_inner].set(w_xp_dt @ w_dt)              # dt_proj ∘ x_proj
        fused = fused.at[:, col_bc:col_bc + d_state].set(w_xp_b)       # B (128-lane aligned)
        fused = fused.at[:, col_bc + d_state:col_bc + 2 * d_state].set(w_xp_c)  # C

        per_layer["w_in_T"].append(nrm((d_model, 2 * d_inner), 0.1))   # in_proj^T
        per_layer["conv_w"].append(nrm((D_CONV, d_inner), 0.3))        # depthwise taps
        per_layer["conv_b"].append(nrm((1, d_inner), 0.1))
        per_layer["w_xp_fused"].append(fused)
        per_layer["dt_bias"].append(nrm((1, d_inner), 0.1))
        per_layer["a_log_T"].append(jnp.log(A))                        # (d_state, d_inner)
        per_layer["d_row"].append(jnp.ones((1, d_inner), jnp.float32))
        per_layer["w_out_T"].append(nrm((d_inner, d_model), 0.1))
        per_layer["ln_g"].append(jnp.ones((1, d_model), jnp.float32))
        per_layer["ln_b"].append(jnp.zeros((1, d_model), jnp.float32))

    for n in _LAYER_NAMES:
        params[n] = jnp.stack(per_layer[n])
    # bf16 MXU operands for the big per-layer matmuls (f32 accumulate in-kernel)
    for n in ("w_in_T", "w_xp_fused", "w_out_T"):
        params[n] = params[n].astype(jnp.bfloat16)
    return params


# ----------------------------------------------------------------------------
if __name__ == "__main__":
    B, d_input, H, W = 2, 3, 4, 4                 # NCHW input, L = H*W = 16
    d_model, d_state, d_output, n_layers = 32, 8, 10, 2

    key = jax.random.PRNGKey(0)
    kx, kp = jax.random.split(key)
    x = jax.random.normal(kx, (B, d_input, H, W), jnp.float32)
    params = init_params(kp, d_input, d_model, d_state, d_output, n_layers)

    out = s6_ssm_forward(x, params)
    out = jax.block_until_ready(out)
    assert out.shape == (B, d_output)
    assert bool(jnp.all(jnp.isfinite(out)))
    print("KERNEL_OK")
</pallas_src>

<mosaic_0001>
module attributes {stable_mosaic.version = 11 : i64} {
  func.func @s6_fused_kernel(%arg0: i32, %arg1: i32, %arg2: memref<1x16x3xf32, #tpu.memory_space<vmem>>, %arg3: memref<3x32xf32, #tpu.memory_space<vmem>>, %arg4: memref<1x32xf32, #tpu.memory_space<vmem>>, %arg5: memref<1x32xf32, #tpu.memory_space<vmem>>, %arg6: memref<1x32xf32, #tpu.memory_space<vmem>>, %arg7: memref<1x32x128xbf16, #tpu.memory_space<vmem>>, %arg8: memref<1x4x64xf32, #tpu.memory_space<vmem>>, %arg9: memref<1x1x64xf32, #tpu.memory_space<vmem>>, %arg10: memref<1x64x256xbf16, #tpu.memory_space<vmem>>, %arg11: memref<1x1x64xf32, #tpu.memory_space<vmem>>, %arg12: memref<1x8x64xf32, #tpu.memory_space<vmem>>, %arg13: memref<1x1x64xf32, #tpu.memory_space<vmem>>, %arg14: memref<1x64x32xbf16, #tpu.memory_space<vmem>>, %arg15: memref<1x1x32xf32, #tpu.memory_space<vmem>>, %arg16: memref<1x1x32xf32, #tpu.memory_space<vmem>>, %arg17: memref<32x10xf32, #tpu.memory_space<vmem>>, %arg18: memref<1x10xf32, #tpu.memory_space<vmem>>, %arg19: memref<1x1x10xf32, #tpu.memory_space<vmem>>, %arg20: memref<16x32xf32, #tpu.memory_space<vmem>>, %arg21: memref<16x64xf32, #tpu.memory_space<vmem>>, %arg22: memref<16x64xf32, #tpu.memory_space<vmem>>, %arg23: memref<16x64xf32, #tpu.memory_space<vmem>>, %arg24: memref<2x16x8xf32, #tpu.memory_space<vmem>>) attributes {dimension_semantics = [#tpu.dimension_semantics<parallel>, #tpu.dimension_semantics<arbitrary>], iteration_bounds = array<i64: 2, 2>, scalar_prefetch = 0 : i64, scratch_operands = 5 : i64, tpu.core_type = #tpu.core_type<tc>, window_params = [{transform_indices = @transform_0, window_bounds = array<i64: 1, 16, 3>}, {pipeline_mode = #tpu.pipeline_mode<synchronous>, transform_indices = @transform_1, window_bounds = array<i64: 3, 32>}, {pipeline_mode = #tpu.pipeline_mode<synchronous>, transform_indices = @transform_2, window_bounds = array<i64: 1, 32>}, {pipeline_mode = #tpu.pipeline_mode<synchronous>, transform_indices = @transform_3, window_bounds = array<i64: 1, 32>}, {pipeline_mode = #tpu.pipeline_mode<synchronous>, transform_indices = @transform_4, window_bounds = array<i64: 1, 32>}, {transform_indices = @transform_5, window_bounds = array<i64: 1, 32, 128>}, {transform_indices = @transform_6, window_bounds = array<i64: 1, 4, 64>}, {transform_indices = @transform_7, window_bounds = array<i64: 1, 1, 64>}, {transform_indices = @transform_8, window_bounds = array<i64: 1, 64, 256>}, {transform_indices = @transform_9, window_bounds = array<i64: 1, 1, 64>}, {transform_indices = @transform_10, window_bounds = array<i64: 1, 8, 64>}, {transform_indices = @transform_11, window_bounds = array<i64: 1, 1, 64>}, {transform_indices = @transform_12, window_bounds = array<i64: 1, 64, 32>}, {transform_indices = @transform_13, window_bounds = array<i64: 1, 1, 32>}, {transform_indices = @transform_14, window_bounds = array<i64: 1, 1, 32>}, {pipeline_mode = #tpu.pipeline_mode<synchronous>, transform_indices = @transform_15, window_bounds = array<i64: 32, 10>}, {pipeline_mode = #tpu.pipeline_mode<synchronous>, transform_indices = @transform_16, window_bounds = array<i64: 1, 10>}, {transform_indices = @transform_17, window_bounds = array<i64: 1, 1, 10>}]} {
    %c0_i32 = arith.constant 0 : i32
    %0 = arith.cmpi eq, %arg1, %c0_i32 : i32
    %1 = arith.extui %0 : i1 to i32
    %c0_i32_0 = arith.constant 0 : i32
    %2 = arith.cmpi ne, %1, %c0_i32_0 : i32
    scf.if %2 {
      %c0_73 = arith.constant 0 : index
      %c0_74 = arith.constant 0 : index
      %c0_75 = arith.constant 0 : index
      %156 = vector.load %arg2[%c0_73, %c0_74, %c0_75] : memref<1x16x3xf32, #tpu.memory_space<vmem>>, vector<1x16x3xf32>
      %157 = vector.shape_cast %156 : vector<1x16x3xf32> to vector<16x3xf32>
      %c0_76 = arith.constant 0 : index
      %c0_77 = arith.constant 0 : index
      %158 = vector.load %arg3[%c0_76, %c0_77] : memref<3x32xf32, #tpu.memory_space<vmem>>, vector<3x32xf32>
      %cst_78 = arith.constant dense<0.000000e+00> : vector<16x32xf32>
      %159 = tpu.matmul %157, %158, %cst_78 {dimension_numbers = #tpu.dot_dimension_numbers<[1], [0], [0], [1], [0, 0, 1, 1], [], []>} : vector<16x3xf32>, vector<3x32xf32>, vector<16x32xf32> -> vector<16x32xf32>
      %c0_79 = arith.constant 0 : index
      %c0_80 = arith.constant 0 : index
      %160 = vector.load %arg4[%c0_79, %c0_80] : memref<1x32xf32, #tpu.memory_space<vmem>>, vector<1x32xf32>
      %161 = vector.broadcast %160 : vector<1x32xf32> to vector<16x32xf32>
      %162 = arith.addf %159, %161 : vector<16x32xf32>
      %c0_81 = arith.constant 0 : index
      %c0_82 = arith.constant 0 : index
      %163 = vector.load %arg5[%c0_81, %c0_82] : memref<1x32xf32, #tpu.memory_space<vmem>>, vector<1x32xf32>
      %c0_83 = arith.constant 0 : index
      %c0_84 = arith.constant 0 : index
      %164 = vector.load %arg6[%c0_83, %c0_84] : memref<1x32xf32, #tpu.memory_space<vmem>>, vector<1x32xf32>
      %cst_85 = arith.constant dense<0.000000e+00> : vector<16xf32>
      %165 = vector.multi_reduction <add>, %162, %cst_85 [1] : vector<16x32xf32> to vector<16xf32>
      %166 = vector.shape_cast %165 : vector<16xf32> to vector<16x1xf32>
      %cst_86 = arith.constant 3.200000e+01 : f32
      %167 = vector.broadcast %cst_86 : f32 to vector<16x1xf32>
      %168 = arith.divf %166, %167 : vector<16x1xf32>
      %169 = vector.broadcast %168 : vector<16x1xf32> to vector<16x32xf32>
      %170 = arith.subf %162, %169 : vector<16x32xf32>
      %171 = arith.mulf %170, %170 : vector<16x32xf32>
      %cst_87 = arith.constant dense<0.000000e+00> : vector<16xf32>
      %172 = vector.multi_reduction <add>, %171, %cst_87 [1] : vector<16x32xf32> to vector<16xf32>
      %173 = vector.shape_cast %172 : vector<16xf32> to vector<16x1xf32>
      %cst_88 = arith.constant 3.200000e+01 : f32
      %174 = vector.broadcast %cst_88 : f32 to vector<16x1xf32>
      %175 = arith.divf %173, %174 : vector<16x1xf32>
      %176 = vector.broadcast %168 : vector<16x1xf32> to vector<16x32xf32>
      %177 = arith.subf %162, %176 : vector<16x32xf32>
      %cst_89 = arith.constant 9.99999974E-6 : f32
      %178 = vector.broadcast %cst_89 : f32 to vector<16x1xf32>
      %179 = arith.addf %175, %178 : vector<16x1xf32>
      %180 = math.rsqrt %179 : vector<16x1xf32>
      %181 = vector.broadcast %180 : vector<16x1xf32> to vector<16x32xf32>
      %182 = arith.mulf %177, %181 : vector<16x32xf32>
      %183 = vector.broadcast %163 : vector<1x32xf32> to vector<16x32xf32>
      %184 = arith.mulf %182, %183 : vector<16x32xf32>
      %185 = vector.broadcast %164 : vector<1x32xf32> to vector<16x32xf32>
      %186 = arith.addf %184, %185 : vector<16x32xf32>
      %c0_90 = arith.constant 0 : index
      %c0_91 = arith.constant 0 : index
      %187 = vector.load %arg20[%c0_90, %c0_91] : memref<16x32xf32, #tpu.memory_space<vmem>>, vector<16x32xf32>
      tpu.vector_store %arg20[%c0_90, %c0_91], %186 {strides = array<i32>} : memref<16x32xf32, #tpu.memory_space<vmem>>, vector<16x32xf32>,
    } else {
    }
    %c0 = arith.constant 0 : index
    %c0_1 = arith.constant 0 : index
    %3 = vector.load %arg20[%c0, %c0_1] : memref<16x32xf32, #tpu.memory_space<vmem>>, vector<16x32xf32>
    %4 = arith.truncf %3 : vector<16x32xf32> to vector<16x32xbf16>
    %c0_2 = arith.constant 0 : index
    %c0_3 = arith.constant 0 : index
    %c0_4 = arith.constant 0 : index
    %5 = vector.load %arg7[%c0_2, %c0_3, %c0_4] : memref<1x32x128xbf16, #tpu.memory_space<vmem>>, vector<1x32x128xbf16>
    %6 = vector.shape_cast %5 : vector<1x32x128xbf16> to vector<32x128xbf16>
    %cst = arith.constant dense<0.000000e+00> : vector<16x128xf32>
    %7 = tpu.matmul %4, %6, %cst {dimension_numbers = #tpu.dot_dimension_numbers<[1], [0], [0], [1], [0, 0, 1, 1], [], []>} : vector<16x32xbf16>, vector<32x128xbf16>, vector<16x128xf32> -> vector<16x128xf32>
    %8 = vector.extract_strided_slice %7 {offsets = [0, 0], sizes = [16, 64], strides = [1, 1]} : vector<16x128xf32> to vector<16x64xf32>
    %9 = vector.extract_strided_slice %7 {offsets = [0, 64], sizes = [16, 64], strides = [1, 1]} : vector<16x128xf32> to vector<16x64xf32>
    %c0_5 = arith.constant 0 : index
    %c0_6 = arith.constant 0 : index
    %c0_7 = arith.constant 0 : index
    %10 = vector.load %arg8[%c0_5, %c0_6, %c0_7] : memref<1x4x64xf32, #tpu.memory_space<vmem>>, vector<1x4x64xf32>
    %11 = vector.shape_cast %10 : vector<1x4x64xf32> to vector<4x64xf32>
    %12 = tpu.iota {dimensions = array<i32: 0>} : vector<16x1xi32>
    %13 = vector.extract_strided_slice %11 {offsets = [3, 0], sizes = [1, 64], strides = [1, 1]} : vector<4x64xf32> to vector<1x64xf32>
    %14 = vector.broadcast %13 : vector<1x64xf32> to vector<16x64xf32>
    %15 = arith.mulf %8, %14 : vector<16x64xf32>
    %c0_8 = arith.constant 0 : index
    %c0_9 = arith.constant 0 : index
    %c0_10 = arith.constant 0 : index
    %16 = vector.load %arg9[%c0_8, %c0_9, %c0_10] : memref<1x1x64xf32, #tpu.memory_space<vmem>>, vector<1x1x64xf32>
    %17 = vector.shape_cast %16 : vector<1x1x64xf32> to vector<1x64xf32>
    %18 = vector.broadcast %17 : vector<1x64xf32> to vector<16x64xf32>
    %19 = arith.addf %15, %18 : vector<16x64xf32>
    %c3_i32 = arith.constant 3 : i32
    %20 = tpu.dynamic_rotate %8 by %c3_i32 dim 0 : vector<16x64xf32>, i32 -> vector<16x64xf32>
    %c3_i32_11 = arith.constant 3 : i32
    %21 = vector.broadcast %c3_i32_11 : i32 to vector<16x1xi32>
    %22 = arith.cmpi sge, %12, %21 : vector<16x1xi32>
    %cst_12 = arith.constant 0.000000e+00 : f32
    %23 = vector.shape_cast %22 : vector<16x1xi1> to vector<16x1xi1>
    %24 = vector.broadcast %23 : vector<16x1xi1> to vector<16x64xi1>
    %25 = vector.broadcast %cst_12 : f32 to vector<16x64xf32>
    %26 = arith.select %24, %20, %25 : vector<16x64xi1>, vector<16x64xf32>
    %27 = vector.extract_strided_slice %11 {offsets = [0, 0], sizes = [1, 64], strides = [1, 1]} : vector<4x64xf32> to vector<1x64xf32>
    %28 = vector.broadcast %27 : vector<1x64xf32> to vector<16x64xf32>
    %29 = arith.mulf %26, %28 : vector<16x64xf32>
    %30 = arith.addf %19, %29 : vector<16x64xf32>
    %c2_i32 = arith.constant 2 : i32
    %31 = tpu.dynamic_rotate %8 by %c2_i32 dim 0 : vector<16x64xf32>, i32 -> vector<16x64xf32>
    %c2_i32_13 = arith.constant 2 : i32
    %32 = vector.broadcast %c2_i32_13 : i32 to vector<16x1xi32>
    %33 = arith.cmpi sge, %12, %32 : vector<16x1xi32>
    %cst_14 = arith.constant 0.000000e+00 : f32
    %34 = vector.shape_cast %33 : vector<16x1xi1> to vector<16x1xi1>
    %35 = vector.broadcast %34 : vector<16x1xi1> to vector<16x64xi1>
    %36 = vector.broadcast %cst_14 : f32 to vector<16x64xf32>
    %37 = arith.select %35, %31, %36 : vector<16x64xi1>, vector<16x64xf32>
    %38 = vector.extract_strided_slice %11 {offsets = [1, 0], sizes = [1, 64], strides = [1, 1]} : vector<4x64xf32> to vector<1x64xf32>
    %39 = vector.broadcast %38 : vector<1x64xf32> to vector<16x64xf32>
    %40 = arith.mulf %37, %39 : vector<16x64xf32>
    %41 = arith.addf %30, %40 : vector<16x64xf32>
    %c1_i32 = arith.constant 1 : i32
    %42 = tpu.dynamic_rotate %8 by %c1_i32 dim 0 : vector<16x64xf32>, i32 -> vector<16x64xf32>
    %c1_i32_15 = arith.constant 1 : i32
    %43 = vector.broadcast %c1_i32_15 : i32 to vector<16x1xi32>
    %44 = arith.cmpi sge, %12, %43 : vector<16x1xi32>
    %cst_16 = arith.constant 0.000000e+00 : f32
    %45 = vector.shape_cast %44 : vector<16x1xi1> to vector<16x1xi1>
    %46 = vector.broadcast %45 : vector<16x1xi1> to vector<16x64xi1>
    %47 = vector.broadcast %cst_16 : f32 to vector<16x64xf32>
    %48 = arith.select %46, %42, %47 : vector<16x64xi1>, vector<16x64xf32>
    %49 = vector.extract_strided_slice %11 {offsets = [2, 0], sizes = [1, 64], strides = [1, 1]} : vector<4x64xf32> to vector<1x64xf32>
    %50 = vector.broadcast %49 : vector<1x64xf32> to vector<16x64xf32>
    %51 = arith.mulf %48, %50 : vector<16x64xf32>
    %52 = arith.addf %41, %51 : vector<16x64xf32>
    %53 = arith.negf %52 : vector<16x64xf32>
    %54 = math.exp %53 : vector<16x64xf32>
    %cst_17 = arith.constant 1.000000e+00 : f32
    %55 = vector.broadcast %cst_17 : f32 to vector<16x64xf32>
    %56 = arith.addf %55, %54 : vector<16x64xf32>
    %57 = arith.divf %55, %56 : vector<16x64xf32>
    %58 = arith.mulf %52, %57 : vector<16x64xf32>
    %59 = arith.truncf %58 : vector<16x64xf32> to vector<16x64xbf16>
    %c0_18 = arith.constant 0 : index
    %c0_19 = arith.constant 0 : index
    %c0_20 = arith.constant 0 : index
    %60 = vector.load %arg10[%c0_18, %c0_19, %c0_20] : memref<1x64x256xbf16, #tpu.memory_space<vmem>>, vector<1x64x256xbf16>
    %61 = vector.shape_cast %60 : vector<1x64x256xbf16> to vector<64x256xbf16>
    %cst_21 = arith.constant dense<0.000000e+00> : vector<16x256xf32>
    %62 = tpu.matmul %59, %61, %cst_21 {dimension_numbers = #tpu.dot_dimension_numbers<[1], [0], [0], [1], [0, 0, 1, 1], [], []>} : vector<16x64xbf16>, vector<64x256xbf16>, vector<16x256xf32> -> vector<16x256xf32>
    %63 = vector.extract_strided_slice %62 {offsets = [0, 0], sizes = [16, 64], strides = [1, 1]} : vector<16x256xf32> to vector<16x64xf32>
    %c0_22 = arith.constant 0 : index
    %c0_23 = arith.constant 0 : index
    %c0_24 = arith.constant 0 : index
    %64 = vector.load %arg11[%c0_22, %c0_23, %c0_24] : memref<1x1x64xf32, #tpu.memory_space<vmem>>, vector<1x1x64xf32>
    %65 = vector.shape_cast %64 : vector<1x1x64xf32> to vector<1x64xf32>
    %66 = vector.broadcast %65 : vector<1x64xf32> to vector<16x64xf32>
    %67 = arith.addf %63, %66 : vector<16x64xf32>
    %cst_25 = arith.constant 0.000000e+00 : f32
    %68 = vector.broadcast %cst_25 : f32 to vector<16x64xf32>
    %69 = arith.maximumf %67, %68 : vector<16x64xf32>
    %70 = vector.broadcast %cst_25 : f32 to vector<16x64xf32>
    %71 = arith.subf %67, %70 : vector<16x64xf32>
    %72 = arith.cmpf one, %71, %71 : vector<16x64xf32>
    %73 = vector.broadcast %cst_25 : f32 to vector<16x64xf32>
    %74 = arith.addf %67, %73 : vector<16x64xf32>
    %75 = math.absf %71 : vector<16x64xf32>
    %cst_26 = arith.constant 0.000000e+00 : f32
    %76 = vector.broadcast %cst_26 : f32 to vector<16x64xf32>
    %77 = arith.subf %76, %75 : vector<16x64xf32>
    %78 = math.exp %77 : vector<16x64xf32>
    %79 = math.log1p %78 : vector<16x64xf32>
    %80 = arith.addf %69, %79 : vector<16x64xf32>
    %81 = arith.select %72, %74, %80 : vector<16x64xi1>, vector<16x64xf32>
    %82 = vector.extract_strided_slice %62 {offsets = [0, 128], sizes = [16, 16], strides = [1, 1]} : vector<16x256xf32> to vector<16x16xf32>
    %83 = tpu.iota {dimensions = array<i32: 0>} : vector<16x16xi32>
    %84 = tpu.iota {dimensions = array<i32: 1>} : vector<16x16xi32>
    %85 = arith.cmpi eq, %83, %84 : vector<16x16xi32>
    %86 = arith.extui %85 : vector<16x16xi1> to vector<16x16xi32>
    %87 = arith.sitofp %86 : vector<16x16xi32> to vector<16x16xf32>
    %cst_27 = arith.constant dense<0.000000e+00> : vector<16x16xf32>
    %88 = tpu.matmul %87, %82, %cst_27 {dimension_numbers = #tpu.dot_dimension_numbers<[1], [1], [0], [0], [0, 0, 1, 0], [], []>} : vector<16x16xf32>, vector<16x16xf32>, vector<16x16xf32> -> vector<16x16xf32>
    %89 = vector.extract_strided_slice %88 {offsets = [0, 0], sizes = [16, 8], strides = [1, 1]} : vector<16x16xf32> to vector<16x8xf32>
    %c0_28 = arith.constant 0 : index
    %c0_29 = arith.constant 0 : index
    %c0_30 = arith.constant 0 : index
    %90 = vector.load %arg24[%c0_28, %c0_29, %c0_30] : memref<2x16x8xf32, #tpu.memory_space<vmem>>, vector<1x16x8xf32>
    %91 = vector.shape_cast %90 : vector<1x16x8xf32> to vector<16x8xf32>
    %92 = vector.shape_cast %89 : vector<16x8xf32> to vector<1x16x8xf32>
    tpu.vector_store %arg24[%c0_28, %c0_29, %c0_30], %92 {strides = array<i32>} : memref<2x16x8xf32, #tpu.memory_space<vmem>>, vector<1x16x8xf32>,
    %93 = vector.extract_strided_slice %88 {offsets = [0, 8], sizes = [16, 8], strides = [1, 1]} : vector<16x16xf32> to vector<16x8xf32>
    %c1 = arith.constant 1 : index
    %c0_31 = arith.constant 0 : index
    %c0_32 = arith.constant 0 : index
    %94 = vector.load %arg24[%c1, %c0_31, %c0_32] : memref<2x16x8xf32, #tpu.memory_space<vmem>>, vector<1x16x8xf32>
    %95 = vector.shape_cast %94 : vector<1x16x8xf32> to vector<16x8xf32>
    %96 = vector.shape_cast %93 : vector<16x8xf32> to vector<1x16x8xf32>
    tpu.vector_store %arg24[%c1, %c0_31, %c0_32], %96 {strides = array<i32>} : memref<2x16x8xf32, #tpu.memory_space<vmem>>, vector<1x16x8xf32>,
    %c0_33 = arith.constant 0 : index
    %c0_34 = arith.constant 0 : index
    %97 = vector.load %arg21[%c0_33, %c0_34] : memref<16x64xf32, #tpu.memory_space<vmem>>, vector<16x64xf32>
    tpu.vector_store %arg21[%c0_33, %c0_34], %81 {strides = array<i32>} : memref<16x64xf32, #tpu.memory_space<vmem>>, vector<16x64xf32>,
    %c0_35 = arith.constant 0 : index
    %c0_36 = arith.constant 0 : index
    %98 = vector.load %arg22[%c0_35, %c0_36] : memref<16x64xf32, #tpu.memory_space<vmem>>, vector<16x64xf32>
    tpu.vector_store %arg22[%c0_35, %c0_36], %58 {strides = array<i32>} : memref<16x64xf32, #tpu.memory_space<vmem>>, vector<16x64xf32>,
    %c0_37 = arith.constant 0 : index
    %c0_38 = arith.constant 0 : index
    %c0_39 = arith.constant 0 : index
    %99 = vector.load %arg12[%c0_37, %c0_38, %c0_39] : memref<1x8x64xf32, #tpu.memory_space<vmem>>, vector<1x8x64xf32>
    %100 = vector.shape_cast %99 : vector<1x8x64xf32> to vector<8x64xf32>
    %101 = math.exp %100 : vector<8x64xf32>
    %cst_40 = arith.constant 0.000000e+00 : f32
    %102 = vector.broadcast %cst_40 : f32 to vector<8x64xf32>
    %103 = arith.subf %102, %101 : vector<8x64xf32>
    %cst_41 = arith.constant 0.000000e+00 : f32
    %104 = vector.broadcast %cst_41 : f32 to vector<8x64xf32>
    %c0_i32_42 = arith.constant 0 : i32
    %c2_i32_43 = arith.constant 2 : i32
    %105 = arith.addi %c0_i32_42, %c2_i32_43 : i32
    %c1_i32_44 = arith.constant 1 : i32
    %106 = scf.for %arg25 = %c0_i32_42 to %105 step %c1_i32_44 iter_args(%arg26 = %104) -> (vector<8x64xf32>)  : i32 {
      %c8_i32 = arith.constant 8 : i32
      %156 = arith.muli %arg25, %c8_i32 : i32
      %157 = tpu.assume_multiple %156, 8 : i32
      %158 = arith.index_cast %157 : i32 to index
      %c0_73 = arith.constant 0 : index
      %159 = vector.load %arg21[%158, %c0_73] : memref<16x64xf32, #tpu.memory_space<vmem>>, vector<8x64xf32>
      %160 = arith.index_cast %157 : i32 to index
      %c0_74 = arith.constant 0 : index
      %161 = vector.load %arg22[%160, %c0_74] : memref<16x64xf32, #tpu.memory_space<vmem>>, vector<8x64xf32>
      %162 = arith.mulf %159, %161 : vector<8x64xf32>
      %163 = arith.index_cast %arg25 : i32 to index
      %c0_75 = arith.constant 0 : index
      %c0_76 = arith.constant 0 : index
      %164 = vector.load %arg24[%163, %c0_75, %c0_76] : memref<2x16x8xf32, #tpu.memory_space<vmem>>, vector<1x16x8xf32>
      %165 = vector.shape_cast %164 : vector<1x16x8xf32> to vector<16x8xf32>
      %166 = vector.extract_strided_slice %165 {offsets = [0, 0], sizes = [8, 8], strides = [1, 1]} : vector<16x8xf32> to vector<8x8xf32>
      %167 = vector.extract_strided_slice %165 {offsets = [8, 0], sizes = [8, 8], strides = [1, 1]} : vector<16x8xf32> to vector<8x8xf32>
      %168 = vector.shape_cast %159 : vector<8x64xf32> to vector<8x1x64xf32>
      %169 = vector.shape_cast %103 : vector<8x64xf32> to vector<1x8x64xf32>
      %170 = vector.broadcast %168 : vector<8x1x64xf32> to vector<8x8x64xf32>
      %171 = vector.broadcast %169 : vector<1x8x64xf32> to vector<8x8x64xf32>
      %172 = arith.mulf %170, %171 : vector<8x8x64xf32>
      %173 = math.exp %172 : vector<8x8x64xf32>
      %174 = vector.extract_strided_slice %173 {offsets = [0, 0, 0], sizes = [1, 8, 64], strides = [1, 1, 1]} : vector<8x8x64xf32> to vector<1x8x64xf32>
      %175 = vector.shape_cast %174 : vector<1x8x64xf32> to vector<8x64xf32>
      %176 = arith.mulf %175, %arg26 : vector<8x64xf32>
      %177 = vector.extract_strided_slice %166 {offsets = [0, 0], sizes = [8, 1], strides = [1, 1]} : vector<8x8xf32> to vector<8x1xf32>
      %178 = vector.extract_strided_slice %162 {offsets = [0, 0], sizes = [1, 64], strides = [1, 1]} : vector<8x64xf32> to vector<1x64xf32>
      %179 = vector.broadcast %177 : vector<8x1xf32> to vector<8x64xf32>
      %180 = vector.broadcast %178 : vector<1x64xf32> to vector<8x64xf32>
      %181 = arith.mulf %179, %180 : vector<8x64xf32>
      %182 = arith.addf %176, %181 : vector<8x64xf32>
      %183 = vector.extract_strided_slice %167 {offsets = [0, 0], sizes = [8, 1], strides = [1, 1]} : vector<8x8xf32> to vector<8x1xf32>
      %184 = vector.broadcast %183 : vector<8x1xf32> to vector<8x64xf32>
      %185 = arith.mulf %184, %182 : vector<8x64xf32>
      %cst_77 = arith.constant dense<0.000000e+00> : vector<64xf32>
      %186 = vector.multi_reduction <add>, %185, %cst_77 [0] : vector<8x64xf32> to vector<64xf32>
      %187 = vector.shape_cast %186 : vector<64xf32> to vector<1x64xf32>
      %188 = vector.extract_strided_slice %173 {offsets = [1, 0, 0], sizes = [1, 8, 64], strides = [1, 1, 1]} : vector<8x8x64xf32> to vector<1x8x64xf32>
      %189 = vector.shape_cast %188 : vector<1x8x64xf32> to vector<8x64xf32>
      %190 = arith.mulf %189, %182 : vector<8x64xf32>
      %191 = vector.extract_strided_slice %166 {offsets = [0, 1], sizes = [8, 1], strides = [1, 1]} : vector<8x8xf32> to vector<8x1xf32>
      %192 = vector.extract_strided_slice %162 {offsets = [1, 0], sizes = [1, 64], strides = [1, 1]} : vector<8x64xf32> to vector<1x64xf32>
      %193 = vector.broadcast %191 : vector<8x1xf32> to vector<8x64xf32>
      %194 = vector.broadcast %192 : vector<1x64xf32> to vector<8x64xf32>
      %195 = arith.mulf %193, %194 : vector<8x64xf32>
      %196 = arith.addf %190, %195 : vector<8x64xf32>
      %197 = vector.extract_strided_slice %167 {offsets = [0, 1], sizes = [8, 1], strides = [1, 1]} : vector<8x8xf32> to vector<8x1xf32>
      %198 = vector.broadcast %197 : vector<8x1xf32> to vector<8x64xf32>
      %199 = arith.mulf %198, %196 : vector<8x64xf32>
      %cst_78 = arith.constant dense<0.000000e+00> : vector<64xf32>
      %200 = vector.multi_reduction <add>, %199, %cst_78 [0] : vector<8x64xf32> to vector<64xf32>
      %201 = vector.shape_cast %200 : vector<64xf32> to vector<1x64xf32>
      %202 = vector.extract_strided_slice %173 {offsets = [2, 0, 0], sizes = [1, 8, 64], strides = [1, 1, 1]} : vector<8x8x64xf32> to vector<1x8x64xf32>
      %203 = vector.shape_cast %202 : vector<1x8x64xf32> to vector<8x64xf32>
      %204 = arith.mulf %203, %196 : vector<8x64xf32>
      %205 = vector.extract_strided_slice %166 {offsets = [0, 2], sizes = [8, 1], strides = [1, 1]} : vector<8x8xf32> to vector<8x1xf32>
      %206 = vector.extract_strided_slice %162 {offsets = [2, 0], sizes = [1, 64], strides = [1, 1]} : vector<8x64xf32> to vector<1x64xf32>
      %207 = vector.broadcast %205 : vector<8x1xf32> to vector<8x64xf32>
      %208 = vector.broadcast %206 : vector<1x64xf32> to vector<8x64xf32>
      %209 = arith.mulf %207, %208 : vector<8x64xf32>
      %210 = arith.addf %204, %209 : vector<8x64xf32>
      %211 = vector.extract_strided_slice %167 {offsets = [0, 2], sizes = [8, 1], strides = [1, 1]} : vector<8x8xf32> to vector<8x1xf32>
      %212 = vector.broadcast %211 : vector<8x1xf32> to vector<8x64xf32>
      %213 = arith.mulf %212, %210 : vector<8x64xf32>
      %cst_79 = arith.constant dense<0.000000e+00> : vector<64xf32>
      %214 = vector.multi_reduction <add>, %213, %cst_79 [0] : vector<8x64xf32> to vector<64xf32>
      %215 = vector.shape_cast %214 : vector<64xf32> to vector<1x64xf32>
      %216 = vector.extract_strided_slice %173 {offsets = [3, 0, 0], sizes = [1, 8, 64], strides = [1, 1, 1]} : vector<8x8x64xf32> to vector<1x8x64xf32>
      %217 = vector.shape_cast %216 : vector<1x8x64xf32> to vector<8x64xf32>
      %218 = arith.mulf %217, %210 : vector<8x64xf32>
      %219 = vector.extract_strided_slice %166 {offsets = [0, 3], sizes = [8, 1], strides = [1, 1]} : vector<8x8xf32> to vector<8x1xf32>
      %220 = vector.extract_strided_slice %162 {offsets = [3, 0], sizes = [1, 64], strides = [1, 1]} : vector<8x64xf32> to vector<1x64xf32>
      %221 = vector.broadcast %219 : vector<8x1xf32> to vector<8x64xf32>
      %222 = vector.broadcast %220 : vector<1x64xf32> to vector<8x64xf32>
      %223 = arith.mulf %221, %222 : vector<8x64xf32>
      %224 = arith.addf %218, %223 : vector<8x64xf32>
      %225 = vector.extract_strided_slice %167 {offsets = [0, 3], sizes = [8, 1], strides = [1, 1]} : vector<8x8xf32> to vector<8x1xf32>
      %226 = vector.broadcast %225 : vector<8x1xf32> to vector<8x64xf32>
      %227 = arith.mulf %226, %224 : vector<8x64xf32>
      %cst_80 = arith.constant dense<0.000000e+00> : vector<64xf32>
      %228 = vector.multi_reduction <add>, %227, %cst_80 [0] : vector<8x64xf32> to vector<64xf32>
      %229 = vector.shape_cast %228 : vector<64xf32> to vector<1x64xf32>
      %230 = vector.extract_strided_slice %173 {offsets = [4, 0, 0], sizes = [1, 8, 64], strides = [1, 1, 1]} : vector<8x8x64xf32> to vector<1x8x64xf32>
      %231 = vector.shape_cast %230 : vector<1x8x64xf32> to vector<8x64xf32>
      %232 = arith.mulf %231, %224 : vector<8x64xf32>
      %233 = vector.extract_strided_slice %166 {offsets = [0, 4], sizes = [8, 1], strides = [1, 1]} : vector<8x8xf32> to vector<8x1xf32>
      %234 = vector.extract_strided_slice %162 {offsets = [4, 0], sizes = [1, 64], strides = [1, 1]} : vector<8x64xf32> to vector<1x64xf32>
      %235 = vector.broadcast %233 : vector<8x1xf32> to vector<8x64xf32>
      %236 = vector.broadcast %234 : vector<1x64xf32> to vector<8x64xf32>
      %237 = arith.mulf %235, %236 : vector<8x64xf32>
      %238 = arith.addf %232, %237 : vector<8x64xf32>
      %239 = vector.extract_strided_slice %167 {offsets = [0, 4], sizes = [8, 1], strides = [1, 1]} : vector<8x8xf32> to vector<8x1xf32>
      %240 = vector.broadcast %239 : vector<8x1xf32> to vector<8x64xf32>
      %241 = arith.mulf %240, %238 : vector<8x64xf32>
      %cst_81 = arith.constant dense<0.000000e+00> : vector<64xf32>
      %242 = vector.multi_reduction <add>, %241, %cst_81 [0] : vector<8x64xf32> to vector<64xf32>
      %243 = vector.shape_cast %242 : vector<64xf32> to vector<1x64xf32>
      %244 = vector.extract_strided_slice %173 {offsets = [5, 0, 0], sizes = [1, 8, 64], strides = [1, 1, 1]} : vector<8x8x64xf32> to vector<1x8x64xf32>
      %245 = vector.shape_cast %244 : vector<1x8x64xf32> to vector<8x64xf32>
      %246 = arith.mulf %245, %238 : vector<8x64xf32>
      %247 = vector.extract_strided_slice %166 {offsets = [0, 5], sizes = [8, 1], strides = [1, 1]} : vector<8x8xf32> to vector<8x1xf32>
      %248 = vector.extract_strided_slice %162 {offsets = [5, 0], sizes = [1, 64], strides = [1, 1]} : vector<8x64xf32> to vector<1x64xf32>
      %249 = vector.broadcast %247 : vector<8x1xf32> to vector<8x64xf32>
      %250 = vector.broadcast %248 : vector<1x64xf32> to vector<8x64xf32>
      %251 = arith.mulf %249, %250 : vector<8x64xf32>
      %252 = arith.addf %246, %251 : vector<8x64xf32>
      %253 = vector.extract_strided_slice %167 {offsets = [0, 5], sizes = [8, 1], strides = [1, 1]} : vector<8x8xf32> to vector<8x1xf32>
      %254 = vector.broadcast %253 : vector<8x1xf32> to vector<8x64xf32>
      %255 = arith.mulf %254, %252 : vector<8x64xf32>
      %cst_82 = arith.constant dense<0.000000e+00> : vector<64xf32>
      %256 = vector.multi_reduction <add>, %255, %cst_82 [0] : vector<8x64xf32> to vector<64xf32>
      %257 = vector.shape_cast %256 : vector<64xf32> to vector<1x64xf32>
      %258 = vector.extract_strided_slice %173 {offsets = [6, 0, 0], sizes = [1, 8, 64], strides = [1, 1, 1]} : vector<8x8x64xf32> to vector<1x8x64xf32>
      %259 = vector.shape_cast %258 : vector<1x8x64xf32> to vector<8x64xf32>
      %260 = arith.mulf %259, %252 : vector<8x64xf32>
      %261 = vector.extract_strided_slice %166 {offsets = [0, 6], sizes = [8, 1], strides = [1, 1]} : vector<8x8xf32> to vector<8x1xf32>
      %262 = vector.extract_strided_slice %162 {offsets = [6, 0], sizes = [1, 64], strides = [1, 1]} : vector<8x64xf32> to vector<1x64xf32>
      %263 = vector.broadcast %261 : vector<8x1xf32> to vector<8x64xf32>
      %264 = vector.broadcast %262 : vector<1x64xf32> to vector<8x64xf32>
      %265 = arith.mulf %263, %264 : vector<8x64xf32>
      %266 = arith.addf %260, %265 : vector<8x64xf32>
      %267 = vector.extract_strided_slice %167 {offsets = [0, 6], sizes = [8, 1], strides = [1, 1]} : vector<8x8xf32> to vector<8x1xf32>
      %268 = vector.broadcast %267 : vector<8x1xf32> to vector<8x64xf32>
      %269 = arith.mulf %268, %266 : vector<8x64xf32>
      %cst_83 = arith.constant dense<0.000000e+00> : vector<64xf32>
      %270 = vector.multi_reduction <add>, %269, %cst_83 [0] : vector<8x64xf32> to vector<64xf32>
      %271 = vector.shape_cast %270 : vector<64xf32> to vector<1x64xf32>
      %272 = vector.extract_strided_slice %173 {offsets = [7, 0, 0], sizes = [1, 8, 64], strides = [1, 1, 1]} : vector<8x8x64xf32> to vector<1x8x64xf32>
      %273 = vector.shape_cast %272 : vector<1x8x64xf32> to vector<8x64xf32>
      %274 = arith.mulf %273, %266 : vector<8x64xf32>
      %275 = vector.extract_strided_slice %166 {offsets = [0, 7], sizes = [8, 1], strides = [1, 1]} : vector<8x8xf32> to vector<8x1xf32>
      %276 = vector.extract_strided_slice %162 {offsets = [7, 0], sizes = [1, 64], strides = [1, 1]} : vector<8x64xf32> to vector<1x64xf32>
      %277 = vector.broadcast %275 : vector<8x1xf32> to vector<8x64xf32>
      %278 = vector.broadcast %276 : vector<1x64xf32> to vector<8x64xf32>
      %279 = arith.mulf %277, %278 : vector<8x64xf32>
      %280 = arith.addf %274, %279 : vector<8x64xf32>
      %281 = vector.extract_strided_slice %167 {offsets = [0, 7], sizes = [8, 1], strides = [1, 1]} : vector<8x8xf32> to vector<8x1xf32>
      %282 = vector.broadcast %281 : vector<8x1xf32> to vector<8x64xf32>
      %283 = arith.mulf %282, %280 : vector<8x64xf32>
      %cst_84 = arith.constant dense<0.000000e+00> : vector<64xf32>
      %284 = vector.multi_reduction <add>, %283, %cst_84 [0] : vector<8x64xf32> to vector<64xf32>
      %285 = vector.shape_cast %284 : vector<64xf32> to vector<1x64xf32>
      %286 = tpu.concatenate %187, %201, %215, %229, %243, %257, %271, %285 in 0 : vector<1x64xf32>, vector<1x64xf32>, vector<1x64xf32>, vector<1x64xf32>, vector<1x64xf32>, vector<1x64xf32>, vector<1x64xf32>, vector<1x64xf32> -> vector<8x64xf32>
      %287 = arith.index_cast %157 : i32 to index
      %c0_85 = arith.constant 0 : index
      %288 = vector.load %arg23[%287, %c0_85] : memref<16x64xf32, #tpu.memory_space<vmem>>, vector<8x64xf32>
      tpu.vector_store %arg23[%287, %c0_85], %286 {strides = array<i32>} : memref<16x64xf32, #tpu.memory_space<vmem>>, vector<8x64xf32>,
      scf.yield %280 : vector<8x64xf32>
    }
    %c2_i32_45 = arith.constant 2 : i32
    %c0_46 = arith.constant 0 : index
    %c0_47 = arith.constant 0 : index
    %107 = vector.load %arg23[%c0_46, %c0_47] : memref<16x64xf32, #tpu.memory_space<vmem>>, vector<16x64xf32>
    %c0_48 = arith.constant 0 : index
    %c0_49 = arith.constant 0 : index
    %c0_50 = arith.constant 0 : index
    %108 = vector.load %arg13[%c0_48, %c0_49, %c0_50] : memref<1x1x64xf32, #tpu.memory_space<vmem>>, vector<1x1x64xf32>
    %109 = vector.shape_cast %108 : vector<1x1x64xf32> to vector<1x64xf32>
    %c0_51 = arith.constant 0 : index
    %c0_52 = arith.constant 0 : index
    %110 = vector.load %arg22[%c0_51, %c0_52] : memref<16x64xf32, #tpu.memory_space<vmem>>, vector<16x64xf32>
    %111 = vector.broadcast %109 : vector<1x64xf32> to vector<16x64xf32>
    %112 = arith.mulf %111, %110 : vector<16x64xf32>
    %113 = arith.addf %107, %112 : vector<16x64xf32>
    %114 = arith.negf %9 : vector<16x64xf32>
    %115 = math.exp %114 : vector<16x64xf32>
    %cst_53 = arith.constant 1.000000e+00 : f32
    %116 = vector.broadcast %cst_53 : f32 to vector<16x64xf32>
    %117 = arith.addf %116, %115 : vector<16x64xf32>
    %118 = arith.divf %116, %117 : vector<16x64xf32>
    %119 = arith.mulf %9, %118 : vector<16x64xf32>
    %120 = arith.mulf %113, %119 : vector<16x64xf32>
    %121 = arith.truncf %120 : vector<16x64xf32> to vector<16x64xbf16>
    %c0_54 = arith.constant 0 : index
    %c0_55 = arith.constant 0 : index
    %c0_56 = arith.constant 0 : index
    %122 = vector.load %arg14[%c0_54, %c0_55, %c0_56] : memref<1x64x32xbf16, #tpu.memory_space<vmem>>, vector<1x64x32xbf16>
    %123 = vector.shape_cast %122 : vector<1x64x32xbf16> to vector<64x32xbf16>
    %cst_57 = arith.constant dense<0.000000e+00> : vector<16x32xf32>
    %124 = tpu.matmul %121, %123, %cst_57 {dimension_numbers = #tpu.dot_dimension_numbers<[1], [0], [0], [1], [0, 0, 1, 1], [], []>} : vector<16x64xbf16>, vector<64x32xbf16>, vector<16x32xf32> -> vector<16x32xf32>
    %125 = arith.addf %3, %124 : vector<16x32xf32>
    %c0_58 = arith.constant 0 : index
    %c0_59 = arith.constant 0 : index
    %c0_60 = arith.constant 0 : index
    %126 = vector.load %arg15[%c0_58, %c0_59, %c0_60] : memref<1x1x32xf32, #tpu.memory_space<vmem>>, vector<1x1x32xf32>
    %127 = vector.shape_cast %126 : vector<1x1x32xf32> to vector<1x32xf32>
    %c0_61 = arith.constant 0 : index
    %c0_62 = arith.constant 0 : index
    %c0_63 = arith.constant 0 : index
    %128 = vector.load %arg16[%c0_61, %c0_62, %c0_63] : memref<1x1x32xf32, #tpu.memory_space<vmem>>, vector<1x1x32xf32>
    %129 = vector.shape_cast %128 : vector<1x1x32xf32> to vector<1x32xf32>
    %cst_64 = arith.constant dense<0.000000e+00> : vector<16xf32>
    %130 = vector.multi_reduction <add>, %125, %cst_64 [1] : vector<16x32xf32> to vector<16xf32>
    %131 = vector.shape_cast %130 : vector<16xf32> to vector<16x1xf32>
    %cst_65 = arith.constant 3.200000e+01 : f32
    %132 = vector.broadcast %cst_65 : f32 to vector<16x1xf32>
    %133 = arith.divf %131, %132 : vector<16x1xf32>
    %134 = vector.broadcast %133 : vector<16x1xf32> to vector<16x32xf32>
    %135 = arith.subf %125, %134 : vector<16x32xf32>
    %136 = arith.mulf %135, %135 : vector<16x32xf32>
    %cst_66 = arith.constant dense<0.000000e+00> : vector<16xf32>
    %137 = vector.multi_reduction <add>, %136, %cst_66 [1] : vector<16x32xf32> to vector<16xf32>
    %138 = vector.shape_cast %137 : vector<16xf32> to vector<16x1xf32>
    %cst_67 = arith.constant 3.200000e+01 : f32
    %139 = vector.broadcast %cst_67 : f32 to vector<16x1xf32>
    %140 = arith.divf %138, %139 : vector<16x1xf32>
    %141 = vector.broadcast %133 : vector<16x1xf32> to vector<16x32xf32>
    %142 = arith.subf %125, %141 : vector<16x32xf32>
    %cst_68 = arith.constant 9.99999974E-6 : f32
    %143 = vector.broadcast %cst_68 : f32 to vector<16x1xf32>
    %144 = arith.addf %140, %143 : vector<16x1xf32>
    %145 = math.rsqrt %144 : vector<16x1xf32>
    %146 = vector.broadcast %145 : vector<16x1xf32> to vector<16x32xf32>
    %147 = arith.mulf %142, %146 : vector<16x32xf32>
    %148 = vector.broadcast %127 : vector<1x32xf32> to vector<16x32xf32>
    %149 = arith.mulf %147, %148 : vector<16x32xf32>
    %150 = vector.broadcast %129 : vector<1x32xf32> to vector<16x32xf32>
    %151 = arith.addf %149, %150 : vector<16x32xf32>
    %c0_69 = arith.constant 0 : index
    %c0_70 = arith.constant 0 : index
    %152 = vector.load %arg20[%c0_69, %c0_70] : memref<16x32xf32, #tpu.memory_space<vmem>>, vector<16x32xf32>
    tpu.vector_store %arg20[%c0_69, %c0_70], %151 {strides = array<i32>} : memref<16x32xf32, #tpu.memory_space<vmem>>, vector<16x32xf32>,
    %c1_i32_71 = arith.constant 1 : i32
    %153 = arith.cmpi eq, %arg1, %c1_i32_71 : i32
    %154 = arith.extui %153 : i1 to i32
    %c0_i32_72 = arith.constant 0 : i32
    %155 = arith.cmpi ne, %154, %c0_i32_72 : i32
    scf.if %155 {
      %cst_73 = arith.constant dense<0.000000e+00> : vector<32xf32>
      %156 = vector.multi_reduction <add>, %151, %cst_73 [0] : vector<16x32xf32> to vector<32xf32>
      %157 = vector.shape_cast %156 : vector<32xf32> to vector<1x32xf32>
      %cst_74 = arith.constant 1.600000e+01 : f32
      %158 = vector.broadcast %cst_74 : f32 to vector<1x32xf32>
      %159 = arith.divf %157, %158 : vector<1x32xf32>
      %c0_75 = arith.constant 0 : index
      %c0_76 = arith.constant 0 : index
      %160 = vector.load %arg17[%c0_75, %c0_76] : memref<32x10xf32, #tpu.memory_space<vmem>>, vector<32x10xf32>
      %cst_77 = arith.constant dense<0.000000e+00> : vector<1x10xf32>
      %161 = tpu.matmul %159, %160, %cst_77 {dimension_numbers = #tpu.dot_dimension_numbers<[1], [0], [0], [1], [0, 0, 1, 1], [], []>} : vector<1x32xf32>, vector<32x10xf32>, vector<1x10xf32> -> vector<1x10xf32>
      %c0_78 = arith.constant 0 : index
      %c0_79 = arith.constant 0 : index
      %162 = vector.load %arg18[%c0_78, %c0_79] : memref<1x10xf32, #tpu.memory_space<vmem>>, vector<1x10xf32>
      %163 = arith.addf %161, %162 : vector<1x10xf32>
      %c0_80 = arith.constant 0 : index
      %c0_81 = arith.constant 0 : index
      %c0_82 = arith.constant 0 : index
      %164 = vector.load %arg19[%c0_80, %c0_81, %c0_82] : memref<1x1x10xf32, #tpu.memory_space<vmem>>, vector<1x1x10xf32>
      %165 = vector.shape_cast %164 : vector<1x1x10xf32> to vector<1x10xf32>
      %166 = vector.shape_cast %163 : vector<1x10xf32> to vector<1x1x10xf32>
      tpu.vector_store %arg19[%c0_80, %c0_81, %c0_82], %166 {strides = array<i32>} : memref<1x1x10xf32, #tpu.memory_space<vmem>>, vector<1x1x10xf32>,
    } else {
    }
    return
  }
  func.func @transform_0(%arg0: i32, %arg1: i32) -> (i32, i32, i32) {
    %c0_i32 = arith.constant 0 : i32
    %c0_i32_0 = arith.constant 0 : i32
    %c0_i32_1 = arith.constant 0 : i32
    return %arg0, %c0_i32, %c0_i32_0 : i32, i32, i32
  }
  func.func @transform_1(%arg0: i32, %arg1: i32) -> (i32, i32) {
    %c0_i32 = arith.constant 0 : i32
    %c0_i32_0 = arith.constant 0 : i32
    %c0_i32_1 = arith.constant 0 : i32
    return %c0_i32, %c0_i32_0 : i32, i32
  }
  func.func @transform_2(%arg0: i32, %arg1: i32) -> (i32, i32) {
    %c0_i32 = arith.constant 0 : i32
    %c0_i32_0 = arith.constant 0 : i32
    %c0_i32_1 = arith.constant 0 : i32
    return %c0_i32, %c0_i32_0 : i32, i32
  }
  func.func @transform_3(%arg0: i32, %arg1: i32) -> (i32, i32) {
    %c0_i32 = arith.constant 0 : i32
    %c0_i32_0 = arith.constant 0 : i32
    %c0_i32_1 = arith.constant 0 : i32
    return %c0_i32, %c0_i32_0 : i32, i32
  }
  func.func @transform_4(%arg0: i32, %arg1: i32) -> (i32, i32) {
    %c0_i32 = arith.constant 0 : i32
    %c0_i32_0 = arith.constant 0 : i32
    %c0_i32_1 = arith.constant 0 : i32
    return %c0_i32, %c0_i32_0 : i32, i32
  }
  func.func @transform_5(%arg0: i32, %arg1: i32) -> (i32, i32, i32) {
    %c0_i32 = arith.constant 0 : i32
    %c0_i32_0 = arith.constant 0 : i32
    %c0_i32_1 = arith.constant 0 : i32
    return %arg1, %c0_i32, %c0_i32_0 : i32, i32, i32
  }
  func.func @transform_6(%arg0: i32, %arg1: i32) -> (i32, i32, i32) {
    %c0_i32 = arith.constant 0 : i32
    %c0_i32_0 = arith.constant 0 : i32
    %c0_i32_1 = arith.constant 0 : i32
    return %arg1, %c0_i32, %c0_i32_0 : i32, i32, i32
  }
  func.func @transform_7(%arg0: i32, %arg1: i32) -> (i32, i32, i32) {
    %c0_i32 = arith.constant 0 : i32
    %c0_i32_0 = arith.constant 0 : i32
    %c0_i32_1 = arith.constant 0 : i32
    return %arg1, %c0_i32, %c0_i32_0 : i32, i32, i32
  }
  func.func @transform_8(%arg0: i32, %arg1: i32) -> (i32, i32, i32) {
    %c0_i32 = arith.constant 0 : i32
    %c0_i32_0 = arith.constant 0 : i32
    %c0_i32_1 = arith.constant 0 : i32
    return %arg1, %c0_i32, %c0_i32_0 : i32, i32, i32
  }
  func.func @transform_9(%arg0: i32, %arg1: i32) -> (i32, i32, i32) {
    %c0_i32 = arith.constant 0 : i32
    %c0_i32_0 = arith.constant 0 : i32
    %c0_i32_1 = arith.constant 0 : i32
    return %arg1, %c0_i32, %c0_i32_0 : i32, i32, i32
  }
  func.func @transform_10(%arg0: i32, %arg1: i32) -> (i32, i32, i32) {
    %c0_i32 = arith.constant 0 : i32
    %c0_i32_0 = arith.constant 0 : i32
    %c0_i32_1 = arith.constant 0 : i32
    return %arg1, %c0_i32, %c0_i32_0 : i32, i32, i32
  }
  func.func @transform_11(%arg0: i32, %arg1: i32) -> (i32, i32, i32) {
    %c0_i32 = arith.constant 0 : i32
    %c0_i32_0 = arith.constant 0 : i32
    %c0_i32_1 = arith.constant 0 : i32
    return %arg1, %c0_i32, %c0_i32_0 : i32, i32, i32
  }
  func.func @transform_12(%arg0: i32, %arg1: i32) -> (i32, i32, i32) {
    %c0_i32 = arith.constant 0 : i32
    %c0_i32_0 = arith.constant 0 : i32
    %c0_i32_1 = arith.constant 0 : i32
    return %arg1, %c0_i32, %c0_i32_0 : i32, i32, i32
  }
  func.func @transform_13(%arg0: i32, %arg1: i32) -> (i32, i32, i32) {
    %c0_i32 = arith.constant 0 : i32
    %c0_i32_0 = arith.constant 0 : i32
    %c0_i32_1 = arith.constant 0 : i32
    return %arg1, %c0_i32, %c0_i32_0 : i32, i32, i32
  }
  func.func @transform_14(%arg0: i32, %arg1: i32) -> (i32, i32, i32) {
    %c0_i32 = arith.constant 0 : i32
    %c0_i32_0 = arith.constant 0 : i32
    %c0_i32_1 = arith.constant 0 : i32
    return %arg1, %c0_i32, %c0_i32_0 : i32, i32, i32
  }
  func.func @transform_15(%arg0: i32, %arg1: i32) -> (i32, i32) {
    %c0_i32 = arith.constant 0 : i32
    %c0_i32_0 = arith.constant 0 : i32
    %c0_i32_1 = arith.constant 0 : i32
    return %c0_i32, %c0_i32_0 : i32, i32
  }
  func.func @transform_16(%arg0: i32, %arg1: i32) -> (i32, i32) {
    %c0_i32 = arith.constant 0 : i32
    %c0_i32_0 = arith.constant 0 : i32
    %c0_i32_1 = arith.constant 0 : i32
    return %c0_i32, %c0_i32_0 : i32, i32
  }
  func.func @transform_17(%arg0: i32, %arg1: i32) -> (i32, i32, i32) {
    %c0_i32 = arith.constant 0 : i32
    %c0_i32_0 = arith.constant 0 : i32
    %c0_i32_1 = arith.constant 0 : i32
    return %arg0, %c0_i32, %c0_i32_0 : i32, i32, i32
  }
}

</mosaic_0001>

<bundles_post_ra>
// kernel: tpu_custom_call.1
= control target key start
LH: loop header
LB: loop body
LE: loop exit
PB: predicated region body
PF: predicated region fallthrough
CT: control target
= control target key end

     0   :  { %s2926_s0 = inlined_call_operand.vmem [shape: f32[2,16,3], index: 0, kind: input, shape index: {}]   ;;  %s2927_s1 = inlined_call_operand.vmem [shape: f32[3,32], index: 1, kind: input, shape index: {}]   ;;  %s2928_s2 = inlined_call_operand.vmem [shape: f32[1,32], index: 2, kind: input, shape index: {}]   ;;  %s2929_s3 = inlined_call_operand.vmem [shape: f32[1,32], index: 3, kind: input, shape index: {}]   ;;  %s2930_s4 = inlined_call_operand.vmem [shape: f32[1,32], index: 4, kind: input, shape index: {}]   ;;  %s2931_s5 = inlined_call_operand.vmem [shape: bf16[2,32,128], index: 5, kind: input, shape index: {}]   ;;  %s2932_s6 = inlined_call_operand.vmem [shape: f32[2,4,64], index: 6, kind: input, shape index: {}]   ;;  %s2933_s7 = inlined_call_operand.vmem [shape: f32[2,1,64], index: 7, kind: input, shape index: {}]   ;;  %s2934_s8 = inlined_call_operand.hbm [shape: bf16[2,64,256], index: 8, kind: input, shape index: {}]   ;;  %s2935_s9 = inlined_call_operand.vmem [shape: f32[2,1,64], index: 9, kind: input, shape index: {}]   ;;  %s2936_s10 = inlined_call_operand.vmem [shape: f32[2,8,64], index: 10, kind: input, shape index: {}]   ;;  %s2937_s11 = inlined_call_operand.vmem [shape: f32[2,1,64], index: 11, kind: input, shape index: {}]   ;;  %s2938_s12 = inlined_call_operand.vmem [shape: bf16[2,64,32], index: 12, kind: input, shape index: {}]   ;;  %s2939_s13 = inlined_call_operand.vmem [shape: f32[2,1,32], index: 13, kind: input, shape index: {}]   ;;  %s2940_s14 = inlined_call_operand.vmem [shape: f32[2,1,32], index: 14, kind: input, shape index: {}]   ;;  %s2941_s15 = inlined_call_operand.vmem [shape: f32[32,10], index: 15, kind: input, shape index: {}]   ;;  %s2942_s16 = inlined_call_operand.vmem [shape: f32[1,10], index: 16, kind: input, shape index: {}]   ;;  %s2943_s17 = inlined_call_operand.hbm [shape: f32[2,1,10], index: 17, kind: output, shape index: {}]  }
   0x1   :  { %2959 = sst [smem:[#allocation26_spill]] %s2926_s0 }
   0x2   :  { %2960 = sst [smem:[#allocation27_spill]] %s2927_s1 }
   0x3   :  { %2961 = sst [smem:[#allocation28_spill]] %s2928_s2 }
   0x4   :  { %2962 = sst [smem:[#allocation29_spill]] %s2929_s3 }
   0x5   :  { %2963 = sst [smem:[#allocation30_spill]] %s2930_s4 }
   0x6   :  { %2964 = sst [smem:[#allocation31_spill]] %s2931_s5 }
   0x7   :  { %2965 = sst [smem:[#allocation32_spill]] %s2932_s6 }
   0x8   :  { %2966 = sst [smem:[#allocation33_spill]] %s2934_s8 }
   0x9   :  { %2967 = sst [smem:[#allocation34_spill]] %s2940_s14 }
   0xa   :  { %2968 = sst [smem:[#allocation35_spill]] %s2941_s15 }
   0xb   :  { %2969 = sst [smem:[#allocation36_spill]] %s2942_s16 }
   0xc   :  { %2970 = sst [smem:[#allocation37_spill]] %s2943_s17 }
   0xd   :  { %22 = vsyncpa [#allocation8], 0 }
   0xe   :  { %24 = vsyncpa [#allocation8 + $0x1], 0 }
   0xf   :  { %25 = vsyncpa [#allocation9], 0 }
  0x10   :  { %27 = vsyncpa [#allocation9 + $0x1], 0  ;;  %s2478_s24 = smov 0   ;;  %s2480_s25 = smov 0  }
  0x11   :  { %s2482_s26 = smov 0   ;;  %s2484_s27 = smov 0  }
  0x12   :  { %s2486_s28 = smov 0   ;;  %s2488_s29 = smov 0  }
  0x13   :  { %s2490_s0 = smov 0   ;;  %s2492_s30 = smov 0  }
  0x14   :  { %s2494_s18 = smov 0   ;;  %s2496_s19 = smov 0  }
  0x15   :  { %s2498_s1 = smov 0  }
  0x16 LB: > { %2971 = sst [smem:[#allocation13_spill]] %s2322_s24  ;;  %s1873_s20 = sadd.s32 4294967295, %s2362_s1   ;;  %s2362_s1 = sphi %s2498_s1, %s33_s1   ;;  %s2358_s19 = sphi %s2496_s19, %s3020_s19   ;;  %s2354_s18 = sphi %s2494_s18, %s3019_s18   ;;  %s2350_s30 = sphi %s2492_s30, %s3018_s30   ;;  %s2346_s0 = sphi %s2490_s0, %s3017_s0   ;;  %s2342_s29 = sphi %s2488_s29, %s3016_s29   ;;  %s2338_s28 = sphi %s2486_s28, %s3015_s28   ;;  %s2334_s27 = sphi %s2484_s27, %s3014_s27   ;;  %s2330_s26 = sphi %s2482_s26, %s3013_s26   ;;  %s2326_s25 = sphi %s2480_s25, %s3022_s25   ;;  %s2322_s24 = sphi %s2478_s24, %s3021_s24  }
  0x17   : > { %2972 = sst [smem:[#allocation14_spill]] %s2330_s26  ;;  %s1874_s21 = sadd.s32 4294967294, %s2362_s1  }
  0x18   : > { %2973 = sst [smem:[#allocation15_spill]] %s2338_s28  ;;  %s42_s22 = sadd.s32 1, %s2354_s18 }
  0x19   : > { %2974 = sst [smem:[#allocation16_spill]] %s2342_s29  ;;  %s45_s23 = sadd.s32 1, %s2358_s19 }
  0x1a   : > { %2975 = sst [smem:[#allocation17_spill]] %s2354_s18  ;;  %p43_p0 = scmp.ge.s32.totalorder %s42_s22, 2 }
  0x1b   : > { %2976 = sst [smem:[#allocation18_spill]] %s2358_s19  ;;  %s240_s17 = sadd.s32 1, %s2342_s29 }
  0x1c   : > { %2977 = sst [smem:[#allocation19_spill]] %s2362_s1  ;;  %p247_p1 = scmp.ne.s32.totalorder %s2342_s29, %s2338_s28 }
  0x1d   : > { %p248_p2 = scmp.eq.s32.totalorder %s2362_s1, 0  ;;  %s3024_s22 = smov (%p43_p0, %s42_s22), 0 }
  0x1e   : > { %2978 = sst [smem:[#allocation20_spill]] %s3024_s22  ;;  %s3026_s23 = smov (!%p43_p0, %s45_s23), %s2358_s19 }
  0x1f   : > { %s237_s16 = ssub.s32 %s2354_s18, %s3024_s22  ;;  %p2544_p3 = por %p248_p2, %p247_p1 }
  0x20   : > { %p47_p4 = scmp.ge.s32.totalorder %s3026_s23, 2  ;;  %p238_p5 = scmp.eq.s32.totalorder %s237_s16, 0 }
  0x21   : > { %p253_p6 = scmp.ne.s32.totalorder %s2338_s28, %s2334_s27  ;;  %p254_p7 = scmp.eq.s32.totalorder %s1873_s20, 0 }
  0x22   : > { %s3028_s23 = smov (%p47_p4, %s3026_s23), 0  ;;  %s464_s2 = sadd.s32 1, %s2330_s26 }
  0x23   : > { %2980 = sst [smem:[#allocation21_spill]] %s3028_s23  ;;  %p2554_p8 = por %p254_p7, %p253_p6 }
  0x24   : > { %s2552_s4 = scalar_select %p238_p5, %s2342_s29, %s240_s17  }
  0x25   : > { %s461_s3 = ssub.s32 %s2358_s19, %s3028_s23  ;;  %p474_p10 = scmp.ne.s32.totalorder %s2330_s26, %s2326_s25 }
  0x26   : > { %2981 = sst [smem:[#allocation22_spill]] %s2552_s4  ;;  %p462_p9 = scmp.eq.s32.totalorder %s461_s3, 0 }
  0x27   : > { %p475_p11 = scmp.eq.s32.totalorder %s1873_s20, 3  ;;  %p480_p13 = scmp.ne.s32.totalorder %s2326_s25, %s2322_s24 }
  0x28   : > { %s2564_s16 = scalar_select %p462_p9, %s2330_s26, %s464_s2  }
  0x29   : > { %p2566_p12 = por %p475_p11, %p474_p10  ;;  %p481_p0 = scmp.eq.s32.totalorder %s1874_s21, 3 }
  0x2a   : > { %2983 = sst [smem:[#allocation23_spill]] %s2564_s16  ;;  %p2001_p1 = scmp.lt.s32.totalorder %s2362_s1, 4 }
  0x2b   : > { %s2984_s27 = scalar_select %p2566_p12, 1, 0 }
  0x2c   : > { %s548_s17 = sand.u32 1, %s2342_s29   ;;  %p2574_p2 = por %p481_p0, %p480_p13 }
  0x2d   : > { %2985 = sst [smem:[#allocation24_spill]] %s2984_s27  ;;  %s1877_s3 = sshll.u32 %s548_s17, 6 }
  0x2e   : > { %s2986_s4 = scalar_select %p2574_p2, 1, 0 }
  0x2f   : > { %s1970_s23 = sshll.u32 %s2354_s18, 6  ;;  %s2988_s8 = sld [smem:[#allocation33_spill]] }
  0x30   : > { %2987 = sst [smem:[#allocation25_spill]] %s2986_s4  ;;  %s552_s26 = scalar_lea.vmem [#allocation7], %s1877_s3 }
  0x31   : > { %s560_s14 = sshll.u32 %s552_s26, 4  ;;  %p1994_p4 = pnand %p2001_p1, %p2544_p3  ;;  %s561_s14 = int_to_ptr.vmem [resolvable:$true] %s560_s14 }
  0x32   : > { %p1880_p5 = scmp.ge.s32.totalorder %s2362_s1, 1  ;;  %p607_p6 = scmp.lt.s32.totalorder %s2362_s1, 5 }
  0x33   : > { %s549_s21 = scalar_lea.sflag [#allocation8], %s548_s17  ;;  %s2372_s29 = smov 128  }
  0x34   : > { %s2373_s24 = smov 8   ;;  %p608_p7 = pnand %p1880_p5, %p607_p6 }
  0x35   : > { %s557_s2 = scalar_lea.hbm %s2988_s8, %s1970_s23  ;;  %s613_s18 = sand.u32 (!%p608_p7), 1, %s2338_s28  }
  0x36   : > { %s558_s16 = sshll.u32 %s557_s2, 4  ;;  %611 = sbr.rel (%p608_p7) target bundleno = 1957 (0x7a5), region = 88  ;;  %s559_s16 = int_to_ptr.hbm [resolvable:$true] %s558_s16 }
  0x37   : > { %1996 = dma.hbm_to_vmem [thread:$0]  (!%p1994_p4), %s559_s16, 1024, %s561_s14, %s549_s21, %s2372_s29, %s2372_s29, %s2373_s24  }
  0x38   : > { %s1881_s19 = sshll.u32 (!%p608_p7), %s613_s18, 6  ;;  %s614_s23 = scalar_lea.sflag (!%p608_p7), [#allocation8], %s613_s18 }
  0x39   : > { %s2587_s20 = scalar_lea.vmem (!%p608_p7), [#allocation7], %s1881_s19 }
  0x3b   : > { %2313 = dma.done.wait (%p2554_p8), %s614_s23, 1024  }
  0x3c   : > { %2315 = vsyncadd (%p2554_p8), %s614_s23, 4294966272  ;;  %p706_p3 = scmp.lt.s32.totalorder %s2350_s30, 1  ;;  %p711_p9 = scmp.lt.s32.totalorder %s2346_s0, 1 }
  0x3d   : > { %s2989_s22 = sld [smem:[#allocation26_spill]]  ;;  %p1890_p8 = scmp.ne.s32.totalorder %s2346_s0, 0 }
  0x3e   : > { %s707_s15 = scalar_select %p706_p3, %s2350_s30, 1 }
  0x3f   : > { %s2598_s24 = scalar_select %p711_p9, %s2346_s0, 1 }
  0x40   : > { %s1971_s26 = sshll.u32 %s707_s15, 4  ;;  %s2990_s5 = sld [smem:[#allocation31_spill]] }
  0x41   : > { %s1972_s17 = sshll.u32 %s2598_s24, 4  ;;  %s1886_s19 = sshll.u32 %s2598_s24, 2 }
  0x42   : > { %s2991_s6 = sld [smem:[#allocation32_spill]]  ;;  %s1887_s29 = sshll.u32 %s2598_s24, 3 }
  0x43   : > { %s710_s16 = scalar_lea.vmem %s2989_s22, %s1971_s26  ;;  %s740_s4 = scalar_lea.vmem %s2939_s13, %s2598_s24 }
  0x44   : > { %s2994_s14 = sld [smem:[#allocation27_spill]] (!%p1890_p8) }
  0x45   : > { %s2995_s15 = sld [smem:[#allocation28_spill]] (!%p1890_p8) }
  0x46   : > { %s2607_s21 = scalar_lea.vmem %s2990_s5, %s1972_s17  ;;  %s2627_s17 = scalar_lea.vmem %s2936_s10, %s1887_s29 }
  0x47   : > { %s2993_s29 = sand.u32 1, %s2326_s25   ;;  %s2997_s28 = sld [smem:[#allocation30_spill]] (!%p1890_p8) }
  0x48   : > { %s2613_s8 = scalar_lea.vmem %s2991_s6, %s1886_s19  ;;  %s1973_s19 = sshll.u32 %s2598_s24, 5 }
  0x49   : > { %s2641_s1 = scalar_lea.vmem %s2938_s12, %s1973_s19  ;;  %s2992_s6 = sld [smem:[#allocation34_spill]] }
  0x4a   : > { %s2649_s22 = scalar_lea.vmem [#allocation10], %s2993_s29 }
  0x4b   : > { %748 = sbr.rel (%p1890_p8) target bundleno = 487 (0x1e7), region = 96 }
  0x4f   : > { %s743_s18 = scalar_lea.vmem %s2992_s6, %s2598_s24 }
  0x50   : > { %v751_v0 = vld [vmem:[%s2994_s14] sm:$0x7]  ;;  %vm763_vm0 = vcmask 1042432   ;;  %vm756_vm1 = vcmask 23552   ;;  %v750_v2 = vld [vmem:[%s710_s16 + $0x8] sm:$0xff]  ;;  %vm792_vm2 = vcmask 261120  }
  0x51   : > { %v749_v1 = vld [vmem:[%s710_s16] sm:$0xff]  ;;  %1891 = vmatpush.msk.msra.mxu0 %vm763_vm0, %v751_v0  ;;  %1988 = vmatpush.msk.msra.mxu1 %vm763_vm0, %v751_v0  ;;  %v2374_v10 = vmov 32.0   ;;  %s2996_s14 = sld [smem:[#allocation29_spill]] }
  0x52   : > { %1892 = vmatmul.msk.f32.vlgmr.msra.gmra.mxu0 %vm756_vm1, %v749_v1  ;;  %1893 = vmatmul.msk.f32.vlgmr.msra.gmra.mxu1 %vm756_vm1, %v750_v2  ;;  %v2123_v3 = vld [vmem:[%s2995_s15] ss:$0 sm:$0xff]  ;;  %2126 = vrcp.f32 %v2374_v10 }
  0x53   : > { %v2125_v44 = vld [vmem:[%s2997_s28] ss:$0 sm:$0xff] }
  0x57   : > { %v2124_v41 = vld [vmem:[%s2996_s14] ss:$0 sm:$0xff] }
  0x58   : > { %v2127_v11 = vpop.eup %2126 }
  0x59   : > { %v800_v12 = vmul.f32 32.0, %v2127_v11  ;;  %vm804_vm3 = vweird.f32 %v2127_v11 }
  0x5b   : > { %v801_v13 = vsub.f32 1.0, %v800_v12 }
  0x5d   : > { %v802_v14 = vmul.f32 %v2127_v11, %v801_v13 }
  0x5f   : > { %v803_v15 = vadd.f32 %v2127_v11, %v802_v14 }
  0x61   : > { %v805_v16 = vsel %vm804_vm3, %v2127_v11, %v803_v15 }
  0xcf   : > { %v784_v4 = vpop.f32.mrf.mxu0  ;;  %v787_v6 = vpop.f32.mrf.mxu1 }
  0xd0   : > { %v785_v5 = vadd.f32 %v2123_v3, %v784_v4  ;;  %v788_v8 = vadd.f32 %v2123_v3, %v787_v6 }
  0xd2   : > { %v793_v7 = vsel %vm792_vm2, %v785_v5, 0.0  ;;  %v796_v9 = vsel %vm792_vm2, %v788_v8, 0.0 }
  0xd3   : > { %794 = vadd.xlane.f32.xlu0 %v793_v7 }
  0xdb   : > { %797 = vadd.xlane.f32.xlu0 %v796_v9 }
 0x146   : > { %v795_v17 = vpop.xlane.xlu0 %794 }
 0x147   : > { %v806_v18 = vmul.f32 %v805_v16, %v795_v17 }
 0x149   : > { %v808_v19 = vsub.f32 %v785_v5, %v806_v18 }
 0x14b   : > { %v810_v20 = vmul.f32 %v808_v19, %v808_v19 }
 0x14d   : > { %v812_v21 = vsel %vm792_vm2, %v810_v20, 0.0 }
 0x14e   : > { %813 = vadd.xlane.f32.xlu1 %v812_v21  ;;  %v798_v22 = vpop.xlane.xlu0 %797 }
 0x14f   : > { %v807_v23 = vmul.f32 %v805_v16, %v798_v22 }
 0x151   : > { %v809_v24 = vsub.f32 %v788_v8, %v807_v23 }
 0x153   : > { %v811_v25 = vmul.f32 %v809_v24, %v809_v24 }
 0x155   : > { %v815_v26 = vsel %vm792_vm2, %v811_v25, 0.0 }
 0x156   : > { %816 = vadd.xlane.f32.xlu1 %v815_v26 }
 0x1c1   : > { %v814_v27 = vpop.xlane.xlu1 %813 }
 0x1c2   : > { %v818_v28 = vmul.f32 %v814_v27, %v805_v16 }
 0x1c4   : > { %v820_v29 = vadd.f32 1e-05, %v818_v28 }
 0x1c6   : > { %2128 = vrsqrt.f32 %v820_v29  ;;  %vm828_vm5 = vweird.f32 %v820_v29 }
 0x1c9   : > { %v817_v30 = vpop.xlane.xlu1 %816 }
 0x1ca   : > { %v819_v31 = vmul.f32 %v817_v30, %v805_v16 }
 0x1cc   : > { %v2129_v32 = vpop.eup %2128  ;;  %v821_v33 = vadd.f32 1e-05, %v819_v31 }
 0x1cd   : > { %v823_v34 = vmul.f32 %v2129_v32, %v820_v29  ;;  %vm829_vm4 = vweird.f32 %v2129_v32 }
 0x1ce   : > { %2130 = vrsqrt.f32 %v821_v33  ;;  %vm830_vm6 = vmor %vm828_vm5, %vm829_vm4  ;;  %vm838_vm8 = vweird.f32 %v821_v33 }
 0x1cf   : > { %v824_v35 = vmul.f32 %v2129_v32, %v823_v34 }
 0x1d1   : > { %v825_v36 = vmul.f32 0.5, %v824_v35 }
 0x1d3   : > { %v826_v37 = vsub.f32 1.5, %v825_v36 }
 0x1d4   : > { %v2131_v38 = vpop.eup %2130 }
 0x1d5   : > { %v827_v39 = vmul.f32 %v2129_v32, %v826_v37  ;;  %v833_v40 = vmul.f32 %v2131_v38, %v821_v33  ;;  %vm839_vm7 = vweird.f32 %v2131_v38 }
 0x1d6   : > { %vm840_vm9 = vmor %vm838_vm8, %vm839_vm7 }
 0x1d7   : > { %v831_v42 = vsel %vm830_vm6, %v2129_v32, %v827_v39  ;;  %v834_v43 = vmul.f32 %v2131_v38, %v833_v40 }
 0x1d8   : > { %v842_v45 = vmul.f32 %v831_v42, %v808_v19 }
 0x1d9   : > { %v835_v46 = vmul.f32 0.5, %v834_v43 }
 0x1da   : > { %v847_v47 = vmul.f32 %v2124_v41, %v842_v45 }
 0x1db   : > { %v836_v48 = vsub.f32 1.5, %v835_v46 }
 0x1dc   : > { %v852_v49 = vadd.f32 %v2125_v44, %v847_v47 }
 0x1dd   : > { %v837_v50 = vmul.f32 %v2131_v38, %v836_v48 }
 0x1de   : > { %854 = vst.msk [vmem:[#allocation2] sm:$0xff] %vm792_vm2, %v852_v49 }
 0x1df   : > { %v841_v51 = vsel %vm840_vm9, %v2131_v38, %v837_v50 }
 0x1e0   : > { %v843_v52 = vmul.f32 %v841_v51, %v809_v24 }
 0x1e2   : > { %v848_v53 = vmul.f32 %v2124_v41, %v843_v52 }
 0x1e4   : > { %v853_v54 = vadd.f32 %v2125_v44, %v848_v53 }
 0x1e6   : > { %855 = vst.msk [vmem:[#allocation2 + $0x8] sm:$0xff] %vm792_vm2, %v853_v54 }
 0x1e7 PF: > { %v1975_v55 = vld [vmem:[%s2607_s21 + $0x8] sm:$0xff]  ;;  %v1974_v56 = vld [vmem:[%s2607_s21] sm:$0xff]  ;;  %vm875_vm10 = vcmask 261120   ;;  %v1931_v60 = vld [vmem:[%s2587_s20 + $0x30] sm:$0xf]  ;;  %v894_v20 = vlaneseq  ;;  %s2998_s21 = scalar_lea.vmem %s2933_s7, %s2598_s24  ;;  %vm1049_vm9 = vcmask 523264   ;;  %s2999_s3 = scalar_lea.vmem %s2935_s9, %s2598_s24 }
 0x1e8   : > { %885 = vmatpush.bf16.msra.mxu0 %v1975_v55  ;;  %v2672_v57 = vld [vmem:[#allocation2] sm:$0xff]  ;;  %v1983_v61 = vld [vmem:[%s2587_s20 + $0x34] sm:$0xf0]  ;;  %v1982_v62 = vld [vmem:[%s2587_s20 + $0x34] sm:$0xf]  ;;  %s2376_s2 = smov 120  }
 0x1e9   : > { %v1932_v63 = vor.u32 %v1983_v61, %v1931_v60  ;;  %v1933_v0 = vld [vmem:[%s2587_s20 + $0x38] sm:$0xf0]  ;;  %v1923_v1 = vld [vmem:[%s2587_s20 + $0x20] sm:$0xf]  ;;  %v1981_v2 = vld [vmem:[%s2587_s20 + $0x24] sm:$0xf0] }
 0x1ea   : > { %v1936_v3 = vor.u32 %v1982_v62, %v1933_v0  ;;  %v1980_v4 = vld [vmem:[%s2587_s20 + $0x24] sm:$0xf]  ;;  %v1925_v5 = vld [vmem:[%s2587_s20 + $0x28] sm:$0xf0]  ;;  %v1924_v6 = vor.u32 %v1981_v2, %v1923_v1  ;;  %v1915_v8 = vld [vmem:[%s2587_s20 + $0x10] sm:$0xf] }
 0x1eb   : > { %1057 = vmatpush.bf16.msra.mxu1 %v1932_v63  ;;  %v1928_v7 = vor.u32 %v1980_v4, %v1925_v5  ;;  %v1979_v9 = vld [vmem:[%s2587_s20 + $0x14] sm:$0xf0]  ;;  %v1978_v10 = vld [vmem:[%s2587_s20 + $0x14] sm:$0xf]  ;;  %v1917_v11 = vld [vmem:[%s2587_s20 + $0x18] sm:$0xf0] }
 0x1ec   : > { %886 = vmatpush.bf16.msra.mxu0 %v1974_v56  ;;  %1071 = vmatpush.bf16.msra.mxu2 %v1936_v3  ;;  %v1916_v12 = vor.u32 %v1979_v9, %v1915_v8  ;;  %v1920_v13 = vor.u32 %v1978_v10, %v1917_v11  ;;  %v1907_v14 = vld [vmem:[%s2587_s20] sm:$0xf]  ;;  %v1977_v15 = vld [vmem:[%s2587_s20 + $0x4] sm:$0xf0]  ;;  %v1976_v16 = vld [vmem:[%s2587_s20 + $0x4] sm:$0xf] }
 0x1ed   : > { %v2674_v58 = vld [vmem:[#allocation2 + $0x8] sm:$0xff]  ;;  %v1908_v18 = vor.u32 %v1977_v15, %v1907_v14  ;;  %v893_v22 = vld [vmem:[%s2613_s8] sm:$0xf]  ;;  %v2699_v23 = vshrl.u32 %v894_v20, 7  ;;  %s2765_s5 = smov 0  }
 0x1ee   : > { %v858_v59 = vpack.c.bf16 %v2674_v58, %v2672_v57  ;;  %v1909_v17 = vld [vmem:[%s2587_s20 + $0x8] sm:$0xf0]  ;;  %v897_v24 = vperm.slane %v893_v22, 3  ;;  %v919_v25 = vperm.slane %v893_v22, 0  ;;  %v937_v26 = vperm.slane %v893_v22, 1 }
 0x1ef   : > { %1058 = vmatpush.bf16.msra.mxu1 %v1924_v6  ;;  %v1912_v19 = vor.u32 %v1976_v16, %v1909_v17  ;;  %vm908_vm11 = vcmp.lt.s32.totalorder %v2699_v23, 3  ;;  %vm911_vm12 = vcmp.ge.s32.totalorder %v2699_v23, 3  ;;  %vm926_vm13 = vcmp.lt.s32.totalorder %v2699_v23, 2  ;;  %v2132_v31 = vld [vmem:[%s2998_s21] ss:$0 sm:$0xff] }
 0x1f0   : > { %1902 = vmatmul.msk.bf16.vlgmr.msra.gmra.mxu0 %vm875_vm10, %v858_v59  ;;  %1072 = vmatpush.bf16.msra.mxu2 %v1928_v7  ;;  %vm944_vm14 = vcmp.lt.s32.totalorder %v2699_v23, 1  ;;  %vm929_vm15 = vcmp.ge.s32.totalorder %v2699_v23, 2  ;;  %vm947_vm0 = vcmp.ge.s32.totalorder %v2699_v23, 1  ;;  %v955_v37 = vperm.slane %v893_v22, 2 }
 0x1f3   : > { %1059 = vmatpush.bf16.msra.mxu1 %v1916_v12 }
 0x1f4   : > { %1073 = vmatpush.bf16.msra.mxu2 %v1920_v13 }
 0x1f7   : > { %1060 = vmatpush.bf16.msra.mxu1 %v1908_v18 }
 0x1f8   : > { %1074 = vmatpush.bf16.msra.mxu2 %v1912_v19 }
 0x26d   : > { %v2695_v21 = vpop.f32.mrf.mxu0 }
 0x26e   : > { %v906_v27 = vrot.slane %v2695_v21, 5  ;;  %v924_v28 = vrot.slane %v2695_v21, 6  ;;  %v898_v30 = vmul.f32 %v897_v24, %v2695_v21  ;;  %v942_v36 = vrot.slane %v2695_v21, 7 }
 0x270   : > { %v904_v42 = vadd.f32 %v2132_v31, %v898_v30 }
 0x275   : > { %v2706_v29 = vpop.f32.mrf.mxu0 }
 0x276   : > { %v899_v32 = vmul.f32 %v897_v24, %v2706_v29  ;;  %v907_v33 = vrot.slane %v2706_v29, 5  ;;  %v925_v34 = vrot.slane %v2706_v29, 6  ;;  %v943_v35 = vrot.slane %v2706_v29, 7 }
 0x278   : > { %v905_v38 = vadd.f32 %v2132_v31, %v899_v32  ;;  %v909_v39 = vsel %vm908_vm11, %v906_v27, %v907_v33  ;;  %v910_v40 = vsel %vm908_vm11, %v907_v33, %v906_v27  ;;  %v927_v41 = vsel %vm926_vm13, %v924_v28, %v925_v34  ;;  %v2133_v32 = vld [vmem:[%s2999_s3] ss:$0 sm:$0xff] }
 0x279   : > { %v917_v43 = vsel %vm911_vm12, %v910_v40, 0.0  ;;  %v921_v44 = vmul.f32 %v919_v25, %v909_v39  ;;  %v928_v45 = vsel %vm926_vm13, %v925_v34, %v924_v28  ;;  %v945_v48 = vsel %vm944_vm14, %v942_v36, %v943_v35 }
 0x27a   : > { %v920_v46 = vmul.f32 %v919_v25, %v917_v43  ;;  %v935_v47 = vsel %vm929_vm15, %v928_v45, 0.0  ;;  %v946_v49 = vsel %vm944_vm14, %v943_v35, %v942_v36  ;;  %v939_v51 = vmul.f32 %v937_v26, %v927_v41 }
 0x27b   : > { %v923_v50 = vadd.f32 %v921_v44, %v905_v38  ;;  %v953_v52 = vsel %vm947_vm0, %v946_v49, 0.0  ;;  %v938_v54 = vmul.f32 %v937_v26, %v935_v47  ;;  %v957_v56 = vmul.f32 %v955_v37, %v945_v48 }
 0x27c   : > { %v922_v53 = vadd.f32 %v920_v46, %v904_v42  ;;  %v956_v60 = vmul.f32 %v955_v37, %v953_v52  ;;  %vm1131_vm11 = vcmask 130048   ;;  %v1124_v42 = vand.u32 127, %v894_v20 }
 0x27d   : > { %v941_v55 = vadd.f32 %v939_v51, %v923_v50  ;;  %v2375_v49 = vmov 0.0   ;;  %v896_v51 = vadd.s32 8, %v2699_v23 }
 0x27e   : > { %v940_v59 = vadd.f32 %v938_v54, %v922_v53  ;;  %vm1125_vm12 = vcmp.eq.s32.totalorder %v2699_v23, %v1124_v42 }
 0x27f   : > { %v959_v61 = vadd.f32 %v957_v56, %v941_v55  ;;  %v1939_v50 = vsel %vm1125_vm12, 1.0, %v2375_v49  ;;  %vm1126_vm13 = vcmp.eq.s32.totalorder %v896_v51, %v1124_v42 }
 0x280   : > { %v958_v62 = vadd.f32 %v956_v60, %v940_v59 }
 0x281   : > { %v1904_v63 = vmul.f32 -1.442695, %v959_v61 }
 0x282   : > { %v1903_v0 = vmul.f32 -1.442695, %v958_v62 }
 0x283   : > { %2134 = vpow2.f32 %v1904_v63  ;;  %v1940_v63 = vsel %vm1126_vm13, 1.0, %v2375_v49 }
 0x284   : > { %2136 = vpow2.f32 %v1903_v0 }
 0x289   : > { %v2135_v1 = vpop.eup %2134 }
 0x28a   : > { %v2137_v2 = vpop.eup %2136  ;;  %v967_v3 = vadd.f32 1.0, %v2135_v1 }
 0x28b   : > { %v966_v4 = vadd.f32 1.0, %v2137_v2 }
 0x28c   : > { %2138 = vrcp.f32 %v967_v3  ;;  %v994_v11 = vand.u32 2147483648, %v967_v3  ;;  %v992_v14 = vand.u32 2147483647, %v967_v3  ;;  %vm988_vm3 = vweird.f32 %v967_v3 }
 0x28d   : > { %2140 = vrcp.f32 %v966_v4  ;;  %v979_v12 = vand.u32 2147483648, %v966_v4  ;;  %v977_v16 = vand.u32 2147483647, %v966_v4  ;;  %vm973_vm4 = vweird.f32 %v966_v4 }
 0x28e   : > { %v995_v19 = vor.u32 1.1754944e-38, %v994_v11  ;;  %vm993_vm7 = vcmp.eq.f32.partialorder %v992_v14, 8.507059e+37 }
 0x28f   : > { %v980_v22 = vor.u32 1.1754944e-38, %v979_v12  ;;  %vm978_vm8 = vcmp.eq.f32.partialorder %v977_v16, 8.507059e+37  ;;  %v1185_v12 = vld [vmem:[%s2627_s17] sm:$0xff] }
 0x292   : > { %v2139_v5 = vpop.eup %2138 }
 0x293   : > { %v2141_v6 = vpop.eup %2140  ;;  %v984_v7 = vmul.f32 %v2139_v5, %v967_v3  ;;  %vm989_vm1 = vweird.f32 %v2139_v5 }
 0x294   : > { %v969_v8 = vmul.f32 %v2141_v6, %v966_v4  ;;  %vm974_vm2 = vweird.f32 %v2141_v6  ;;  %vm990_vm5 = vmor %vm988_vm3, %vm989_vm1 }
 0x295   : > { %v985_v9 = vsub.f32 1.0, %v984_v7  ;;  %vm975_vm6 = vmor %vm973_vm4, %vm974_vm2  ;;  %vm1167_vm2 = vcmask 64512  }
 0x296   : > { %v970_v10 = vsub.f32 1.0, %v969_v8 }
 0x297   : > { %v986_v13 = vmul.f32 %v2139_v5, %v985_v9 }
 0x298   : > { %v971_v15 = vmul.f32 %v2141_v6, %v970_v10 }
 0x299   : > { %v987_v17 = vadd.f32 %v2139_v5, %v986_v13  ;;  %v1186_v13 = vmul.f32 1.442695, %v1185_v12 }
 0x29a   : > { %v972_v18 = vadd.f32 %v2141_v6, %v971_v15 }
 0x29b   : > { %v991_v24 = vsel %vm990_vm5, %v2139_v5, %v987_v17 }
 0x29c   : > { %v976_v25 = vsel %vm975_vm6, %v2141_v6, %v972_v18  ;;  %v996_v26 = vsel %vm993_vm7, %v995_v19, %v991_v24  ;;  %v2763_v18 = vmov 0.0  }
 0x29d   : > { %v981_v27 = vsel %vm978_vm8, %v980_v22, %v976_v25  ;;  %v999_v28 = vmul.f32 %v996_v26, %v959_v61 }
 0x29e   : > { %v998_v30 = vmul.f32 %v981_v27, %v958_v62 }
 0x29f   : > { %1184 = vst.msk [vmem:[#allocation4 + $0x8] sm:$0xff] %vm1049_vm9, %v999_v28 }
 0x2a0   : > { %v1000_v31 = vpack.c.bf16 %v999_v28, %v998_v30  ;;  %1183 = vst.msk [vmem:[#allocation4] sm:$0xff] %vm1049_vm9, %v998_v30 }
 0x2a2   : > { %1937 = vmatmul.msk.bf16.vlgmr.msra.gmra.mxu1 %vm1049_vm9, %v1000_v31  ;;  %1938 = vmatmul.msk.bf16.vlgmr.msra.gmra.mxu2 %vm1049_vm9, %v1000_v31 }
 0x31f   : > { %v1062_v33 = vpop.f32.mrf.mxu1 }
 0x320   : > { %v1085_v34 = vadd.f32 %v2133_v32, %v1062_v33 }
 0x322   : > { %v1093_v35 = vand.u32 2147483647, %v1085_v34  ;;  %v1087_v61 = vmax.f32 %v1085_v34, 0.0  ;;  %vm1089_vm15 = vcmp.ne.f32.partialorder %v1085_v34, %v1085_v34 }
 0x324   : > { %v1095_v36 = vsub.f32 0.0, %v1093_v35 }
 0x325   : > { %v1076_v37 = vpop.f32.mrf.mxu2 }
 0x326   : > { %v1097_v38 = vmul.f32 1.442695, %v1095_v36 }
 0x327   : > { %v1064_v39 = vpop.f32.mrf.mxu1 }
 0x328   : > { %2142 = vpow2.f32 %v1097_v38  ;;  %v1086_v40 = vadd.f32 %v2133_v32, %v1064_v39 }
 0x32a   : > { %v1094_v41 = vand.u32 2147483647, %v1086_v40  ;;  %v1088_v6 = vmax.f32 %v1086_v40, 0.0  ;;  %vm1090_vm1 = vcmp.ne.f32.partialorder %v1086_v40, %v1086_v40 }
 0x32c   : > { %v1096_v43 = vsub.f32 0.0, %v1094_v41 }
 0x32d   : > { %v1078_v44 = vpop.f32.mrf.mxu2 }
 0x32e   : > { %v2143_v45 = vpop.eup %2142  ;;  %v1099_v46 = vmul.f32 1.442695, %v1096_v43  ;;  %1941 = vmatpush.xpose.msk.msra.mxu3 %vm1131_vm11, %v1078_v44 }
 0x32f   : > { %v1101_v47 = vadd.f32 1.0, %v2143_v45  ;;  %v1104_v48 = vmul.f32 -0.5, %v2143_v45  ;;  %v1107_v20 = vand.u32 2147483647, %v2143_v45 }
 0x330   : > { %2144 = vpow2.f32 %v1099_v46 }
 0x331   : > { %2146 = vlog2.f32 %v1101_v47  ;;  %v1105_v52 = vadd.f32 1.0, %v1104_v48  ;;  %vm1108_vm14 = vcmp.lt.f32.partialorder %v1107_v20, 0.0004427343 }
 0x332   : > { %1942 = vmatpush.xpose.msk.msra.mxu3 %vm1131_vm11, %v1076_v37 }
 0x333   : > { %v1106_v59 = vmul.f32 %v2143_v45, %v1105_v52 }
 0x335   : > { %1943 = vmatmul.msk.f32.vlgmr.msra.gmra.mxu3 %vm1131_vm11, %v1939_v50 }
 0x336   : > { %v2145_v53 = vpop.eup %2144 }
 0x337   : > { %v2147_v54 = vpop.eup %2146  ;;  %v1110_v55 = vadd.f32 1.0, %v2145_v53  ;;  %v1113_v60 = vmul.f32 -0.5, %v2145_v53  ;;  %v1116_v2 = vand.u32 2147483647, %v2145_v53 }
 0x338   : > { %v1103_v56 = vmul.f32 0.6931472, %v2147_v54 }
 0x339   : > { %2148 = vlog2.f32 %v1110_v55  ;;  %v1114_v1 = vadd.f32 1.0, %v1113_v60  ;;  %vm1117_vm0 = vcmp.lt.f32.partialorder %v1116_v2, 0.0004427343 }
 0x33a   : > { %v1109_v62 = vsel %vm1108_vm14, %v1106_v59, %v1103_v56  ;;  %2150 = vpow2.f32 %v1186_v13 }
 0x33b   : > { %v1119_v0 = vadd.f32 %v1109_v62, %v1087_v61  ;;  %v1115_v5 = vmul.f32 %v2145_v53, %v1114_v1 }
 0x33d   : > { %v1121_v23 = vsel %vm1089_vm15, %v1085_v34, %v1119_v0  ;;  %1944 = vmatmul.msk.f32.gmra.mxu3 %vm1131_vm11, %v1940_v63 }
 0x33e   : > { %1181 = vst.msk [vmem:[#allocation3] sm:$0xff] %vm1049_vm9, %v1121_v23 }
 0x33f   : > { %v2149_v3 = vpop.eup %2148 }
 0x340   : > { %v1112_v4 = vmul.f32 0.6931472, %v2149_v3  ;;  %v2151_v14 = vpop.eup %2150 }
 0x341   : > { %v2759_v15 = vsub.f32 0.0, %v2151_v14 }
 0x342   : > { %v1118_v7 = vsel %vm1117_vm0, %v1115_v5, %v1112_v4 }
 0x343   : > { %v1120_v8 = vadd.f32 %v1118_v7, %v1088_v6 }
 0x345   : > { %v1122_v9 = vsel %vm1090_vm1, %v1086_v40, %v1120_v8 }
 0x346   : > { %1182 = vst.msk [vmem:[#allocation3 + $0x8] sm:$0xff] %vm1049_vm9, %v1122_v9 }
 0x3b8   : > { %v1161_v10 = vpop.f32.mrf.mxu3 }
 0x3b9   : > { %1168 = vst.msk [vmem:[#allocation6] sm:$0xff] %vm1167_vm2, %v1161_v10  ;;  %1172 = vrot.lane.b32.xlu0 %v1161_v10, %s2376_s2 }
 0x3c0   : > { %v1164_v11 = vpop.f32.mrf.mxu3 }
 0x3c1   : > { %1169 = vst.msk [vmem:[#allocation6 + $0x8] sm:$0xff] %vm1167_vm2, %v1164_v11  ;;  %1174 = vrot.lane.b32.xlu0 %v1164_v11, %s2376_s2 }
 0x42b   : > { %v1173_v16 = vpop.permute.xlu0 %1172 }
 0x42c   : > { %1179 = vst.msk [vmem:[#allocation6 + $0x10] sm:$0xff] %vm1167_vm2, %v1173_v16 }
 0x433   : > { %v1175_v17 = vpop.permute.xlu0 %1174 }
 0x434   : > { %1180 = vst.msk [vmem:[#allocation6 + $0x18] sm:$0xff] %vm1167_vm2, %v1175_v17 }
 0x435 LB: >> { %v2377_v19 = vmov 1   ;;  %v2378_v22 = vmov 0   ;;  %s1946_s17 = sshll.u32 %s2370_s5, 4  ;;  %v2379_v24 = vmov 3   ;;  %v2380_v27 = vmov 2   ;;  %s2775_s15 = sshll.u32 %s2370_s5, 3  ;;  %s2370_s5 = sphi %s2765_s5, %s1194_s5   ;;  %v2366_v18 = vphi %v2763_v18, %v2805_v18  }
 0x436   : >> { %2153 = vset.pattern.permute.xlu1 %v2377_v19  ;;  %2152 = vset.pattern.permute.xlu0 %v2378_v22  ;;  %s1203_s6 = scalar_lea.vmem [#allocation6], %s1946_s17  ;;  %v2381_v28 = vmov 4   ;;  %v2382_v30 = vmov 5   ;;  %v2383_v31 = vmov 6   ;;  %v2384_v32 = vmov 7   ;;  %s1197_s16 = scalar_lea.vmem [#allocation3], %s2775_s15 }
 0x437   : >> { %2155 = vset.pattern.permute.xlu2 %v2379_v24  ;;  %v1198_v33 = vld [vmem:[%s1197_s16] sm:$0xff]  ;;  %s1199_s26 = scalar_lea.vmem [#allocation4], %s2775_s15  ;;  %vm1416_vm3 = vcmask 1040384   ;;  %vm1418_vm4 = vcmask 1041408   ;;  %vm1420_vm5 = vcmask 1042432   ;;  %vm1422_vm6 = vcmask 1043456  }
 0x438   : >> { %v1214_v34 = vperm.slane %v1198_v33, 0  ;;  %v1207_v35 = vrot.slane %v1198_v33, 1  ;;  %v1208_v39 = vrot.slane %v1198_v33, 2  ;;  %v1209_v43 = vrot.slane %v1198_v33, 3  ;;  %v1200_v44 = vld [vmem:[%s1199_s26] sm:$0xff]  ;;  %s1430_s14 = scalar_lea.vmem [#allocation5], %s2775_s15 }
 0x439   : >> { %v1210_v48 = vrot.slane %v1198_v33, 4  ;;  %v2784_v50 = vmul.f32 %v1200_v44, %v1198_v33  ;;  %v1211_v54 = vrot.slane %v1198_v33, 5  ;;  %v1212_v3 = vrot.slane %v1198_v33, 6  ;;  %s1194_s5 = sadd.s32 1, %s2370_s5  }
 0x43a   : >> { %v1230_v37 = vmul.f32 %v1214_v34, %v2759_v15  ;;  %v1215_v38 = vperm.slane %v1207_v35, 0  ;;  %v1216_v42 = vperm.slane %v1208_v39, 0  ;;  %v1217_v49 = vperm.slane %v1209_v43, 0  ;;  %p1191_p10 = scmp.ge.s32.totalorder %s1194_s5, 2  }
 0x43b   : >> { %v1204_v25 = vld [vmem:[%s1203_s6] sm:$0xff]  ;;  %v1205_v26 = vld [vmem:[%s1203_s6 + $0x8] sm:$0xff]  ;;  %v1218_v20 = vperm.slane %v1210_v48, 0  ;;  %v1260_v55 = vperm.slane %v2784_v50, 0  ;;  %v1219_v63 = vperm.slane %v1211_v54, 0  ;;  %v1281_v1 = vperm.slane %v2784_v50, 1  ;;  %s3000_s8 = scalar_lea.vmem (%p1191_p10), %s2937_s11, %s2598_s24 }
 0x43c   : >> { %1278 = vperm.xlu1 %2153, %v1204_v25   ;;  %1257 = vperm.xlu0 %2152, %v1204_v25   ;;  %v1238_v40 = vmul.f32 1.442695, %v1230_v37  ;;  %v1231_v41 = vmul.f32 %v1215_v38, %v2759_v15  ;;  %v1232_v47 = vmul.f32 %v1216_v42, %v2759_v15  ;;  %v1233_v53 = vmul.f32 %v1217_v49, %v2759_v15  ;;  %s2385_s19 = smov (%p1191_p10), 64   ;;  %p1966_p11 = scmp.ne.s32.totalorder (%p1191_p10), %s2346_s0, 1 }
 0x43d   : >> { %1318 = vperm.xlu2 %2155, %v1204_v25   ;;  %v1234_v61 = vmul.f32 %v1218_v20, %v2759_v15  ;;  %v1235_v6 = vmul.f32 %v1219_v63, %v2759_v15  ;;  %v1220_v9 = vperm.slane %v1212_v3, 0  ;;  %v1213_v10 = vrot.slane %v1198_v33, 7 }
 0x43e   : >> { %2167 = vpow2.f32 %v1238_v40  ;;  %v1240_v46 = vmul.f32 1.442695, %v1231_v41  ;;  %v1242_v52 = vmul.f32 1.442695, %v1232_v47  ;;  %v1244_v62 = vmul.f32 1.442695, %v1233_v53 }
 0x43f   : >> { %v1246_v5 = vmul.f32 1.442695, %v1234_v61  ;;  %v1301_v12 = vperm.slane %v2784_v50, 2  ;;  %v1221_v22 = vperm.slane %v1213_v10, 0  ;;  %v1341_v34 = vperm.slane %v2784_v50, 4 }
 0x440   : >> { %2169 = vpow2.f32 %v1240_v46  ;;  %v1361_v38 = vperm.slane %v2784_v50, 5  ;;  %vm1424_vm7 = vcmask 1044480   ;;  %vm1426_vm8 = vcmask 1045504  }
 0x441   : >> { %2171 = vpow2.f32 %v1242_v52  ;;  %vm1428_vm11 = vcmask 1046528  }
 0x442   : >> { %2173 = vpow2.f32 %v1244_v62 }
 0x443   : >> { %2175 = vpow2.f32 %v1246_v5 }
 0x444   : >> { %2154 = vset.pattern.permute.xlu1 %v2380_v27  ;;  %1265 = vperm.xlu0 %2152, %v1205_v26   ;;  %v2168_v51 = vpop.eup %2167 }
 0x445   : >> { %1298 = vperm.xlu1 %2154, %v1204_v25   ;;  %2156 = vset.pattern.permute.xlu2 %v2381_v28  ;;  %v1254_v56 = vmul.f32 %v2366_v18, %v2168_v51  ;;  %v1236_v18 = vmul.f32 %v1220_v9, %v2759_v15 }
 0x446   : >> { %1338 = vperm.xlu2 %2156, %v1204_v25   ;;  %v2170_v0 = vpop.eup %2169 }
 0x447   : >> { %v2172_v11 = vpop.eup %2171 }
 0x44c   : >> { %2157 = vset.pattern.permute.xlu0 %v2382_v30 }
 0x44d   : >> { %2158 = vset.pattern.permute.xlu1 %v2383_v31  ;;  %1358 = vperm.xlu0 %2157, %v1204_v25  }
 0x44e   : >> { %1378 = vperm.xlu1 %2158, %v1204_v25   ;;  %2159 = vset.pattern.permute.xlu2 %v2377_v19  ;;  %v1248_v19 = vmul.f32 1.442695, %v1235_v6 }
 0x44f   : >> { %1285 = vperm.xlu2 %2159, %v1205_v26  }
 0x450   : >> { %2177 = vpow2.f32 %v1248_v19 }
 0x455   : >> { %2162 = vset.pattern.permute.xlu0 %v2384_v32 }
 0x456   : >> { %2160 = vset.pattern.permute.xlu1 %v2380_v27  ;;  %1398 = vperm.xlu0 %2162, %v1204_v25   ;;  %v1321_v25 = vperm.slane %v2784_v50, 3 }
 0x457   : >> { %1305 = vperm.xlu1 %2160, %v1205_v26   ;;  %2161 = vset.pattern.permute.xlu2 %v2379_v24  ;;  %v2174_v24 = vpop.eup %2173 }
 0x458   : >> { %1325 = vperm.xlu2 %2161, %v1205_v26  }
 0x45f   : >> { %2163 = vset.pattern.permute.xlu1 %v2381_v28 }
 0x460   : >> { %1345 = vperm.xlu1 %2163, %v1205_v26   ;;  %2164 = vset.pattern.permute.xlu2 %v2382_v30  ;;  %v1250_v30 = vmul.f32 1.442695, %v1236_v18 }
 0x461   : >> { %1365 = vperm.xlu2 %2164, %v1205_v26  }
 0x462   : >> { %2179 = vpow2.f32 %v1250_v30 }
 0x468   : >> { %2165 = vset.pattern.permute.xlu1 %v2383_v31  ;;  %v1237_v31 = vmul.f32 %v1221_v22, %v2759_v15 }
 0x469   : >> { %1385 = vperm.xlu1 %2165, %v1205_v26   ;;  %2166 = vset.pattern.permute.xlu2 %v2384_v32  ;;  %v2176_v32 = vpop.eup %2175 }
 0x46a   : >> { %1405 = vperm.xlu2 %2166, %v1205_v26   ;;  %v1252_v40 = vmul.f32 1.442695, %v1237_v31  ;;  %v2178_v44 = vpop.eup %2177 }
 0x46b   : >> { %v2180_v20 = vpop.eup %2179 }
 0x46c   : >> { %2181 = vpow2.f32 %v1252_v40 }
 0x472   : >> { %v2182_v61 = vpop.eup %2181 }
 0x497   : >> { %v2778_v36 = vpop.permute.xlu2 %1318 }
 0x498   : >> { %v1322_v33 = vmul.f32 %v1321_v25, %v2778_v36  ;;  %v1381_v36 = vperm.slane %v2784_v50, 6 }
 0x4a0   : >> { %v1339_v45 = vpop.permute.xlu2 %1338 }
 0x4a1   : >> { %v1342_v41 = vmul.f32 %v1341_v34, %v1339_v45 }
 0x4a9   : >> { %v1286_v2 = vpop.permute.xlu2 %1285 }
 0x4ae   : >> { %v1279_v59 = vpop.permute.xlu1 %1278  ;;  %v1258_v60 = vpop.permute.xlu0 %1257 }
 0x4af   : >> { %v1261_v23 = vmul.f32 %v1260_v55, %v1258_v60  ;;  %v1282_v7 = vmul.f32 %v1281_v1, %v1279_v59  ;;  %v1401_v55 = vperm.slane %v2784_v50, 7 }
 0x4b1   : >> { %v1262_v4 = vadd.f32 %v1261_v23, %v1254_v56 }
 0x4b2   : >> { %v1326_v27 = vpop.permute.xlu2 %1325 }
 0x4b3   : >> { %v1276_v8 = vmul.f32 %v2170_v0, %v1262_v4 }
 0x4b5   : >> { %v1283_v13 = vadd.f32 %v1282_v7, %v1276_v8 }
 0x4b6   : >> { %v1266_v14 = vpop.permute.xlu0 %1265 }
 0x4b7   : >> { %v1299_v16 = vpop.permute.xlu1 %1298  ;;  %v1296_v17 = vmul.f32 %v2172_v11, %v1283_v13  ;;  %v1288_v46 = vmul.f32 %v1286_v2, %v1283_v13  ;;  %v1268_v49 = vmul.f32 %v1266_v14, %v1262_v4 }
 0x4b8   : >> { %v1302_v26 = vmul.f32 %v1301_v12, %v1299_v16 }
 0x4b9   : >> { %v1289_v53 = vsel %vm1049_vm9, %v1288_v46, 0.0  ;;  %v1269_v45 = vsel %vm1049_vm9, %v1268_v49, 0.0 }
 0x4ba   : >> { %v1303_v28 = vadd.f32 %v1302_v26, %v1296_v17  ;;  %v1290_v62 = vrot.slane %v1289_v53, 4  ;;  %v1270_v1 = vrot.slane %v1269_v45, 4 }
 0x4bb   : >> { %v1366_v51 = vpop.permute.xlu2 %1365 }
 0x4bc   : >> { %v1316_v35 = vmul.f32 %v2174_v24, %v1303_v28  ;;  %v1291_v9 = vadd.f32 %v1290_v62, %v1289_v53  ;;  %v1271_v10 = vadd.f32 %v1270_v1, %v1269_v45 }
 0x4be   : >> { %v1323_v37 = vadd.f32 %v1322_v33, %v1316_v35  ;;  %v1292_v16 = vrot.slane %v1291_v9, 2  ;;  %v1272_v17 = vrot.slane %v1271_v10, 2 }
 0x4bf   : >> { %v1359_v39 = vpop.permute.xlu0 %1358 }
 0x4c0   : >> { %v1336_v42 = vmul.f32 %v2176_v32, %v1323_v37  ;;  %v1379_v43 = vpop.permute.xlu1 %1378  ;;  %v1362_v47 = vmul.f32 %v1361_v38, %v1359_v39  ;;  %v1328_v63 = vmul.f32 %v1326_v27, %v1323_v37  ;;  %v1293_v30 = vadd.f32 %v1292_v16, %v1291_v9 }
 0x4c1   : >> { %v1382_v56 = vmul.f32 %v1381_v36, %v1379_v43  ;;  %v1273_v31 = vadd.f32 %v1272_v17, %v1271_v10 }
 0x4c2   : >> { %v1343_v48 = vadd.f32 %v1342_v41, %v1336_v42  ;;  %v1329_v6 = vsel %vm1049_vm9, %v1328_v63, 0.0  ;;  %v1294_v39 = vrot.slane %v1293_v30, 1 }
 0x4c3   : >> { %v1330_v12 = vrot.slane %v1329_v6, 4  ;;  %v1274_v40 = vrot.slane %v1273_v31, 1 }
 0x4c4   : >> { %v1356_v52 = vmul.f32 %v2178_v44, %v1343_v48  ;;  %v1406_v8 = vpop.permute.xlu2 %1405 }
 0x4c5   : >> { %v1331_v26 = vadd.f32 %v1330_v12, %v1329_v6  ;;  %v1275_v36 = vadd.f32 %v1274_v40, %v1273_v31  ;;  %v1947_v12 = vmul.f32 (%p1191_p10), -1.442695, %v2695_v21 }
 0x4c6   : >> { %v1363_v54 = vadd.f32 %v1362_v47, %v1356_v52 }
 0x4c7   : >> { %v1332_v35 = vrot.slane %v1331_v26, 2  ;;  %2186 = vpow2.f32 (%p1191_p10), %v1947_v12 }
 0x4c8   : >> { %v1376_v59 = vmul.f32 %v2180_v20, %v1363_v54  ;;  %v1399_v60 = vpop.permute.xlu0 %1398  ;;  %v1368_v7 = vmul.f32 %v1366_v51, %v1363_v54  ;;  %v1295_v51 = vadd.f32 %v1294_v39, %v1293_v30 }
 0x4c9   : >> { %v1306_v0 = vpop.permute.xlu1 %1305  ;;  %v1402_v2 = vmul.f32 %v1401_v55, %v1399_v60  ;;  %v1333_v46 = vadd.f32 %v1332_v35, %v1331_v26 }
 0x4ca   : >> { %v1308_v23 = vmul.f32 %v1306_v0, %v1303_v28  ;;  %v1383_v3 = vadd.f32 %v1382_v56, %v1376_v59  ;;  %v1369_v14 = vsel %vm1049_vm9, %v1368_v7, 0.0  ;;  %v1417_v60 = vsel %vm1416_vm3, %v1275_v36, %v1295_v51  ;;  %v2183_v51 = vld [vmem:[%s3000_s8] ss:$0 sm:$0xff] (%p1191_p10)  ;;  %v1436_v36 = vld [vmem:[#allocation4 + $0x8] sm:$0xff] (%p1191_p10) }
 0x4cb   : >> { %v1370_v27 = vrot.slane %v1369_v14, 4  ;;  %v1334_v45 = vrot.slane %v1333_v46, 1 }
 0x4cc   : >> { %v1309_v4 = vsel %vm1049_vm9, %v1308_v23, 0.0  ;;  %v1396_v5 = vmul.f32 %v2182_v61, %v1383_v3 }
 0x4cd   : >> { %v1310_v50 = vrot.slane %v1309_v4, 4  ;;  %v1371_v37 = vadd.f32 %v1370_v27, %v1369_v14  ;;  %v1335_v1 = vadd.f32 %v1334_v45, %v1333_v46  ;;  %v1987_v14 = vld [vmem:[%s2641_s1 + $0x18] sm:$0xff] (%p1191_p10)  ;;  %v2187_v16 = vpop.eup (%p1191_p10), %2186 }
 0x4ce   : >> { %v2805_v18 = vadd.f32 %v1402_v2, %v1396_v5   ;;  %1534 = vmatpush.bf16.msrb.mxu0 (%p1191_p10), %v1987_v14 }
 0x4cf   : >> { %v1311_v11 = vadd.f32 %v1310_v50, %v1309_v4  ;;  %v1372_v47 = vrot.slane %v1371_v37, 2 }
 0x4d0   : >> { %v1408_v13 = vmul.f32 %v1406_v8, %v2805_v18 }
 0x4d1   : >> { %v1312_v22 = vrot.slane %v1311_v11, 2  ;;  %v1373_v56 = vadd.f32 %v1372_v47, %v1371_v37  ;;  %v1986_v47 = vld [vmem:[%s2641_s1 + $0x10] sm:$0xff] (%p1191_p10) }
 0x4d2   : >> { %v1346_v19 = vpop.permute.xlu1 %1345  ;;  %v1409_v24 = vsel %vm1049_vm9, %v1408_v13, 0.0  ;;  %v1948_v13 = vmul.f32 (%p1191_p10), -1.442695, %v2706_v29  ;;  %1535 = vmatpush.bf16.msrb.mxu0 (%p1191_p10), %v1986_v47 }
 0x4d3   : >> { %v1348_v25 = vmul.f32 %v1346_v19, %v1343_v48  ;;  %v1410_v32 = vrot.slane %v1409_v24, 4  ;;  %v1313_v34 = vadd.f32 %v1312_v22, %v1311_v11  ;;  %v1374_v23 = vrot.slane %v1373_v56, 1 }
 0x4d4   : > { %2188 = vpow2.f32 (%p1191_p10), %v1948_v13  ;;  %v1450_v19 = vadd.f32 (%p1191_p10), 1.0, %v2187_v16 }
 0x4d5   : >> { %v1349_v28 = vsel %vm1049_vm9, %v1348_v25, 0.0  ;;  %v1411_v41 = vadd.f32 %v1410_v32, %v1409_v24  ;;  %v1314_v43 = vrot.slane %v1313_v34, 1  ;;  %v1375_v7 = vadd.f32 %v1374_v23, %v1373_v56 }
 0x4d6   : >> { %v1350_v33 = vrot.slane %v1349_v28, 4  ;;  %2190 = vrcp.f32 (%p1191_p10), %v1450_v19  ;;  %v1463_v26 = vand.u32 (%p1191_p10), 2147483648, %v1450_v19  ;;  %vm1457_vm12 = vweird.f32 (%p1191_p10), %v1450_v19 }
 0x4d7   : >> { %v1412_v52 = vrot.slane %v1411_v41, 2  ;;  %v1315_v53 = vadd.f32 %v1314_v43, %v1313_v34 }
 0x4d8   : >> { %v1351_v38 = vadd.f32 %v1350_v33, %v1349_v28  ;;  %v1461_v28 = vand.u32 (%p1191_p10), 2147483647, %v1450_v19  ;;  %v1464_v32 = vor.u32 (%p1191_p10), 1.1754944e-38, %v1463_v26 }
 0x4d9   : >> { %v1413_v61 = vadd.f32 %v1412_v52, %v1411_v41  ;;  %v1419_v62 = vsel %vm1418_vm4, %v1417_v60, %v1315_v53  ;;  %v1441_v53 = vmul.f32 (%p1191_p10), %v2183_v51, %v1436_v36 }
 0x4da   : >> { %v1352_v42 = vrot.slane %v1351_v38, 2  ;;  %v1421_v4 = vsel %vm1420_vm5, %v1419_v62, %v1335_v1  ;;  %v2189_v17 = vpop.eup (%p1191_p10), %2188  ;;  %vm1462_vm1 = vcmp.eq.f32.partialorder (%p1191_p10), %v1461_v28, 8.507059e+37 }
 0x4db   : >> { %v1386_v44 = vpop.permute.xlu1 %1385  ;;  %v1451_v22 = vadd.f32 (%p1191_p10), 1.0, %v2189_v17 }
 0x4dc   : >> { %v1353_v48 = vadd.f32 %v1352_v42, %v1351_v38  ;;  %v1388_v49 = vmul.f32 %v1386_v44, %v1383_v3  ;;  %v1414_v3 = vrot.slane %v1413_v61, 1  ;;  %v2191_v24 = vpop.eup (%p1191_p10), %2190 }
 0x4dd   : > { %2192 = vrcp.f32 (%p1191_p10), %v1451_v22  ;;  %v1453_v25 = vmul.f32 (%p1191_p10), %v2191_v24, %v1450_v19  ;;  %vm1458_vm13 = vweird.f32 (%p1191_p10), %v2191_v24  ;;  %vm1472_vm14 = vweird.f32 (%p1191_p10), %v1451_v22 }
 0x4de   : >> { %v1389_v20 = vsel %vm1049_vm9, %v1388_v49, 0.0  ;;  %v1354_v54 = vrot.slane %v1353_v48, 1  ;;  %v1415_v8 = vadd.f32 %v1414_v3, %v1413_v61  ;;  %vm1459_vm0 = vmor (%p1191_p10), %vm1457_vm12, %vm1458_vm13  ;;  %v1478_v34 = vand.u32 (%p1191_p10), 2147483648, %v1451_v22  ;;  %v1984_v49 = vld [vmem:[%s2641_s1] sm:$0xff] (%p1191_p10) }
 0x4df   : >> { %v1390_v55 = vrot.slane %v1389_v20, 4  ;;  %v1454_v15 = vsub.f32 (%p1191_p10), 1.0, %v1453_v25  ;;  %v1476_v37 = vand.u32 (%p1191_p10), 2147483647, %v1451_v22  ;;  %v2386_v3 = vmov (%p1191_p10), 32.0  }
 0x4e0   : >> { %v1355_v63 = vadd.f32 %v1354_v54, %v1353_v48  ;;  %v1479_v41 = vor.u32 (%p1191_p10), 1.1754944e-38, %v1478_v34  ;;  %v1985_v48 = vld [vmem:[%s2641_s1 + $0x8] sm:$0xff] (%p1191_p10)  ;;  %2194 = vrcp.f32 (%p1191_p10), %v2386_v3 }
 0x4e1   : >> { %v1391_v59 = vadd.f32 %v1390_v55, %v1389_v20  ;;  %v1455_v31 = vmul.f32 (%p1191_p10), %v2191_v24, %v1454_v15  ;;  %vm1477_vm3 = vcmp.eq.f32.partialorder (%p1191_p10), %v1476_v37, 8.507059e+37  ;;  %1536 = vmatpush.bf16.msrb.mxu0 (%p1191_p10), %v1985_v48 }
 0x4e2   : >> { %v1423_v5 = vsel %vm1422_vm6, %v1421_v4, %v1355_v63 }
 0x4e3   : >> { %v1392_v0 = vrot.slane %v1391_v59, 2  ;;  %v1425_v9 = vsel %vm1424_vm7, %v1423_v5, %v1375_v7  ;;  %v2193_v18 = vpop.eup (%p1191_p10), %2192  ;;  %v1456_v35 = vadd.f32 (%p1191_p10), %v2191_v24, %v1455_v31 }
 0x4e4   : > { %v1468_v27 = vmul.f32 (%p1191_p10), %v2193_v18, %v1451_v22  ;;  %vm1473_vm15 = vweird.f32 (%p1191_p10), %v2193_v18 }
 0x4e5   : >> { %v1393_v2 = vadd.f32 %v1392_v0, %v1391_v59  ;;  %vm1474_vm2 = vmor (%p1191_p10), %vm1472_vm14, %vm1473_vm15  ;;  %v1460_v39 = vsel (%p1191_p10), %vm1459_vm0, %v2191_v24, %v1456_v35  ;;  %1537 = vmatpush.bf16.msrb.mxu0 (%p1191_p10), %v1984_v49  ;;  %v2184_v35 = vld [vmem:[%s740_s4] ss:$0 sm:$0xff] (%p1191_p10) }
 0x4e6   : > { %v1469_v30 = vsub.f32 (%p1191_p10), 1.0, %v1468_v27  ;;  %v1465_v40 = vsel (%p1191_p10), %vm1462_vm1, %v1464_v32, %v1460_v39  ;;  %v2195_v4 = vpop.eup (%p1191_p10), %2194  ;;  %v2185_v39 = vld [vmem:[%s743_s18] ss:$0 sm:$0xff] (%p1191_p10) }
 0x4e7   : >> { %v1394_v6 = vrot.slane %v1393_v2, 1  ;;  %v1482_v42 = vmul.f32 (%p1191_p10), %v1465_v40, %v2695_v21  ;;  %v1435_v21 = vld [vmem:[#allocation4] sm:$0xff] (%p1191_p10)  ;;  %v1555_v5 = vmul.f32 (%p1191_p10), 32.0, %v2195_v4 }
 0x4e8   : > { %v1470_v33 = vmul.f32 (%p1191_p10), %v2193_v18, %v1469_v30  ;;  %v1440_v20 = vmul.f32 (%p1191_p10), %v2183_v51, %v1435_v21 }
 0x4e9   : >> { %v1395_v50 = vadd.f32 %v1394_v6, %v1393_v2  ;;  %1193 = sbr.rel (!%p1191_p10) target bundleno = 1077 (0x435), region = 183  ;;  %1486 = vrot.lane.b32.xlu0 (%p1191_p10), %v1482_v42, %s2385_s19  ;;  %v1556_v6 = vsub.f32 (%p1191_p10), 1.0, %v1555_v5 }
 0x4ea   : > { %v1471_v38 = vadd.f32 (%p1191_p10), %v2193_v18, %v1470_v33 }
 0x4eb   : >> { %v1427_v10 = vsel %vm1426_vm8, %v1425_v9, %v1395_v50  ;;  %v1557_v7 = vmul.f32 (%p1191_p10), %v2195_v4, %v1556_v6 }
 0x4ec   : >> { %v1429_v11 = vsel %vm1428_vm11, %v1427_v10, %v1415_v8  ;;  %v1475_v43 = vsel (%p1191_p10), %vm1474_vm2, %v2193_v18, %v1471_v38 }
 0x4ed   : >> { %1431 = vst.msk [vmem:[%s1430_s14] sm:$0xff] %vm1049_vm9, %v1429_v11  ;;  %v1480_v44 = vsel (%p1191_p10), %vm1477_vm3, %v1479_v41, %v1475_v43  ;;  %v1558_v50 = vadd.f32 (%p1191_p10), %v2195_v4, %v1557_v7 }
 0x4ee   : > { %v1483_v46 = vmul.f32 %v1480_v44, %v2706_v29  ;;  %s3002_s18 = sld [smem:[#allocation35_spill]] (!%p1966_p11) }
 0x4ef   : > { %s3004_s14 = sld [smem:[#allocation36_spill]] (!%p1966_p11) }
 0x4f1   : > { %1488 = vrot.lane.b32.xlu0 %v1483_v46, %s2385_s19 }
 0x4f4   : > { %v1432_v54 = vld [vmem:[#allocation5] sm:$0xff]  ;;  %v1433_v55 = vld [vmem:[#allocation5 + $0x8] sm:$0xff]  ;;  %s3003_s3 = smov (!%p1966_p11), %s3002_s18 }
 0x4f5   : > { %v1442_v29 = vadd.f32 %v1440_v20, %v1432_v54  ;;  %v1443_v45 = vadd.f32 %v1441_v53, %v1433_v55 }
 0x55b   : > { %v1487_v52 = vpop.permute.xlu0 %1486 }
 0x55c   : > { %v1492_v59 = vmul.f32 %v1487_v52, %v1442_v29 }
 0x563   : > { %v1489_v56 = vpop.permute.xlu0 %1488 }
 0x564   : > { %v1493_v60 = vmul.f32 %v1489_v56, %v1443_v45 }
 0x566   : > { %v1494_v61 = vpack.c.bf16 %v1493_v60, %v1492_v59 }
 0x568   : > { %1965 = vmatmul.msk.bf16.vlgmr.msrb.gmra.mxu0 %vm1049_vm9, %v1494_v61  ;;  %vm1559_vm9 = vweird.f32 %v2195_v4 }
 0x569   : > { %v1560_v8 = vsel %vm1559_vm9, %v2195_v4, %v1558_v50 }
 0x5e5   : > { %v1539_v62 = vpop.f32.mrf.mxu0 }
 0x5e6   : > { %v1544_v63 = vadd.f32 %v1539_v62, %v2672_v57 }
 0x5e8   : > { %v1548_v0 = vsel %vm875_vm10, %v1544_v63, 0.0 }
 0x5e9   : > { %1549 = vadd.xlane.f32.xlu1 %v1548_v0 }
 0x5ed   : > { %v1541_v1 = vpop.f32.mrf.mxu0 }
 0x5ee   : > { %v1545_v23 = vadd.f32 %v1541_v1, %v2674_v58 }
 0x5f0   : > { %v1551_v2 = vsel %vm875_vm10, %v1545_v23, 0.0 }
 0x5f1   : > { %1552 = vadd.xlane.f32.xlu1 %v1551_v2 }
 0x65c   : > { %v1550_v9 = vpop.xlane.xlu1 %1549 }
 0x65d   : > { %v1561_v57 = vmul.f32 %v1560_v8, %v1550_v9 }
 0x65f   : > { %v1563_v10 = vsub.f32 %v1544_v63, %v1561_v57 }
 0x661   : > { %v1565_v11 = vmul.f32 %v1563_v10, %v1563_v10 }
 0x663   : > { %v1567_v12 = vsel %vm875_vm10, %v1565_v11, 0.0 }
 0x664   : > { %1568 = vadd.xlane.f32.xlu2 %v1567_v12  ;;  %v1553_v58 = vpop.xlane.xlu1 %1552 }
 0x665   : > { %v1562_v13 = vmul.f32 %v1560_v8, %v1553_v58 }
 0x667   : > { %v1564_v14 = vsub.f32 %v1545_v23, %v1562_v13 }
 0x669   : > { %v1566_v16 = vmul.f32 %v1564_v14, %v1564_v14 }
 0x66b   : > { %v1570_v17 = vsel %vm875_vm10, %v1566_v16, 0.0 }
 0x66c   : > { %1571 = vadd.xlane.f32.xlu2 %v1570_v17 }
 0x6d7   : > { %v1569_v19 = vpop.xlane.xlu2 %1568 }
 0x6d8   : > { %v1573_v22 = vmul.f32 %v1569_v19, %v1560_v8 }
 0x6da   : > { %v1575_v24 = vadd.f32 1e-05, %v1573_v22 }
 0x6dc   : > { %2196 = vrsqrt.f32 %v1575_v24  ;;  %vm1583_vm5 = vweird.f32 %v1575_v24 }
 0x6df   : > { %v1572_v18 = vpop.xlane.xlu2 %1571 }
 0x6e0   : > { %v1574_v25 = vmul.f32 %v1572_v18, %v1560_v8 }
 0x6e2   : > { %v2197_v26 = vpop.eup %2196  ;;  %v1576_v27 = vadd.f32 1e-05, %v1574_v25 }
 0x6e3   : > { %v1578_v15 = vmul.f32 %v2197_v26, %v1575_v24  ;;  %vm1584_vm4 = vweird.f32 %v2197_v26 }
 0x6e4   : > { %2198 = vrsqrt.f32 %v1576_v27  ;;  %vm1585_vm6 = vmor %vm1583_vm5, %vm1584_vm4  ;;  %vm1593_vm8 = vweird.f32 %v1576_v27 }
 0x6e5   : > { %v1579_v28 = vmul.f32 %v2197_v26, %v1578_v15 }
 0x6e7   : > { %v1580_v30 = vmul.f32 0.5, %v1579_v28 }
 0x6e9   : > { %v1581_v31 = vsub.f32 1.5, %v1580_v30 }
 0x6ea   : > { %v2199_v32 = vpop.eup %2198 }
 0x6eb   : > { %v1582_v33 = vmul.f32 %v2197_v26, %v1581_v31  ;;  %v1588_v34 = vmul.f32 %v2199_v32, %v1576_v27  ;;  %vm1594_vm7 = vweird.f32 %v2199_v32 }
 0x6ec   : > { %vm1595_vm11 = vmor %vm1593_vm8, %vm1594_vm7 }
 0x6ed   : > { %v1586_v37 = vsel %vm1585_vm6, %v2197_v26, %v1582_v33  ;;  %v1589_v38 = vmul.f32 %v2199_v32, %v1588_v34 }
 0x6ee   : > { %v1597_v40 = vmul.f32 %v1586_v37, %v1563_v10 }
 0x6ef   : > { %v1590_v41 = vmul.f32 0.5, %v1589_v38 }
 0x6f0   : > { %v1602_v42 = vmul.f32 %v2184_v35, %v1597_v40 }
 0x6f1   : > { %v1591_v43 = vsub.f32 1.5, %v1590_v41 }
 0x6f2   : > { %v1607_v44 = vadd.f32 %v2185_v39, %v1602_v42 }
 0x6f3   : > { %v1592_v46 = vmul.f32 %v2199_v32, %v1591_v43 }
 0x6f4   : > { %1609 = vst.msk [vmem:[#allocation2] sm:$0xff] %vm875_vm10, %v1607_v44 }
 0x6f5   : > { %v1596_v47 = vsel %vm1595_vm11, %v2199_v32, %v1592_v46 }
 0x6f6   : > { %v1598_v48 = vmul.f32 %v1596_v47, %v1564_v14 }
 0x6f8   : > { %v1603_v49 = vmul.f32 %v2184_v35, %v1598_v48  ;;  %1614 = sbr.rel (%p1966_p11) target bundleno = 1937 (0x791), region = 107 }
 0x6fa   : > { %v1608_v51 = vadd.f32 %v2185_v39, %v1603_v49 }
 0x6fc   : > { %1610 = vst.msk [vmem:[#allocation2 + $0x8] sm:$0xff] %vm875_vm10, %v1608_v51 }
 0x6fd   : > { %v1635_v21 = vld [vmem:[%s3002_s18 + $0x18] sm:$0xff]  ;;  %v1634_v36 = vld [vmem:[%s3003_s3 + $0x10] sm:$0xff]  ;;  %v1615_v52 = vsel %vm875_vm10, %v1607_v44, 0.0  ;;  %v1616_v20 = vsel %vm875_vm10, %v1608_v51, 0.0  ;;  %v2387_v54 = vmov 16.0   ;;  %v1633_v55 = vld [vmem:[%s3003_s3 + $0x8] sm:$0xff] }
 0x6fe   : > { %1652 = vmatpush.msra.mxu0 %v1635_v21  ;;  %v1617_v53 = vadd.f32 %v1616_v20, %v1615_v52  ;;  %2200 = vrcp.f32 %v2387_v54  ;;  %v1632_v45 = vld [vmem:[%s3003_s3] sm:$0xff]  ;;  %vm1660_vm13 = vcmask 73728  }
 0x6ff   : > { %v1636_v5 = vld [vmem:[%s3004_s14] sm:$0x1] }
 0x700   : > { %1653 = vmatpush.msra.mxu0 %v1634_v36  ;;  %v1618_v29 = vrot.slane %v1617_v53, 4 }
 0x702   : > { %1654 = vmatpush.msra.mxu0 %v1633_v55  ;;  %v1619_v56 = vadd.f32 %v1618_v29, %v1617_v53 }
 0x704   : > { %v2201_v59 = vpop.eup %2200  ;;  %1655 = vmatpush.msra.mxu0 %v1632_v45  ;;  %v1620_v60 = vrot.slane %v1619_v56, 2 }
 0x705   : > { %v1625_v61 = vmul.f32 16.0, %v2201_v59  ;;  %vm1629_vm12 = vweird.f32 %v2201_v59 }
 0x706   : > { %v1621_v62 = vadd.f32 %v1620_v60, %v1619_v56 }
 0x707   : > { %v1626_v63 = vsub.f32 1.0, %v1625_v61 }
 0x708   : > { %v1622_v0 = vrot.slane %v1621_v62, 1 }
 0x709   : > { %v1627_v1 = vmul.f32 %v2201_v59, %v1626_v63 }
 0x70a   : > { %v1623_v23 = vadd.f32 %v1622_v0, %v1621_v62 }
 0x70b   : > { %v1628_v2 = vadd.f32 %v2201_v59, %v1627_v1 }
 0x70d   : > { %v1630_v3 = vsel %vm1629_vm12, %v2201_v59, %v1628_v2 }
 0x70e   : > { %v1631_v4 = vmul.f32 %v1630_v3, %v1623_v23 }
 0x710   : > { %1967 = vmatmul.msk.f32.vlgmr.msra.gmra.mxu0 %vm875_vm10, %v1631_v4 }
 0x78d   : > { %v1657_v6 = vpop.f32.mrf.mxu0 }
 0x78e   : > { %v1658_v7 = vadd.f32 %v1657_v6, %v1636_v5 }
 0x790   : > { %1661 = vst.msk [vmem:[%s2649_s22] sm:$0x1] %vm1660_vm13, %v1658_v7 }
 0x791 PF: > { %s3005_s28 = sld [smem:[#allocation37_spill]]  ;;  %s1673_s21 = sshll.u32 %s2649_s22, 4  ;;  %s1674_s21 = int_to_ptr.vmem [resolvable:$true] %s1673_s21 }
 0x792   : > { %s3008_s29 = sand.u32 1, %s2326_s25  }
 0x793   : > { %s1663_s24 = scalar_lea.sflag [#allocation9], %s3008_s29 }
 0x797   : > { %s3006_s8 = smov %s3005_s28  ;;  %s1671_s20 = scalar_lea.hbm %s3005_s28, %s2350_s30 }
 0x798   : > { %s1675_s27 = sshll.u32 %s1671_s20, 4  ;;  %s2252_s17 = scalar_lea.hbm %s3006_s8, 2  ;;  %s1676_s27 = int_to_ptr.hbm [resolvable:$true] %s1675_s27 }
 0x799   : > { %s2246_s4 = sshra.s32 %s1676_s27, 4  ;;  %s2247_s4 = int_to_ptr.hbm [resolvable:$true] %s2246_s4 }
 0x79a   : > { %s2248_s18 = scalar_lea.hbm %s2247_s4, 1  ;;  %p2253_p4 = scmp.lt.s32.totalorder %s2247_s4, %s3006_s8 }
 0x79b   : > { %p2249_p13 = scmp.ne.s32.totalorder %s2247_s4, %s2248_s18  ;;  %p2254_p5 = scmp.lt.s32.totalorder %s2252_s17, %s2248_s18 }
 0x79d   : > { %p2250_p0 = pnand %p2249_p13, %p2566_p12  ;;  %p2255_p6 = por %p2254_p5, %p2253_p4 }
 0x79f   : > { %p2251_p1 = pneg %p2250_p0 }
 0x7a1   : > { %p2256_p7 = pnand %p2255_p6, %p2251_p1 }
 0x7a3   : > { %2259 = shalt.err (!%p2256_p7)
}
 0x7a4   : > { %1991 = dma.vmem_to_hbm [thread:$0]  (%p2566_p12), %s1674_s21, 16, %s1676_s27, %s1663_s24  }
 0x7a5 PF: > { %s3009_s30 = sld [smem:[#allocation19_spill]] }
 0x7a6   : > { %s3010_s22 = sld [smem:[#allocation13_spill]] }
 0x7ab   : > { %p2002_p3 = scmp.ge.s32.totalorder %s3009_s30, 2 }
 0x7ac   : > { %s1687_s16 = sand.u32 1, %s3010_s22  }
 0x7ad   : > { %p1998_p9 = pnand %p2002_p3, %p2574_p2  ;;  %s1688_s26 = scalar_lea.sflag [#allocation9], %s1687_s16 }
 0x7af   : > { %p1999_p8 = pneg %p1998_p9 }
 0x7b1   : > { %2317 = dma.done.wait (%p1999_p8), %s1688_s26, 16  }
 0x7b2   : > { %2319 = vsyncadd (%p1999_p8), %s1688_s26, 4294967280  ;;  %s33_s1 = sadd.s32 1, %s3009_s30   ;;  %s3012_s14 = sld [smem:[#allocation14_spill]] }
 0x7b3   : > { %p30_p10 = scmp.ge.s32.totalorder %s33_s1, 6   ;;  %s3013_s26 = sld [smem:[#allocation23_spill]] }
 0x7b4   : > { %s3014_s27 = sld [smem:[#allocation15_spill]]  ;;  %s3021_s24 = smov %s2326_s25 }
 0x7b5   : > { %s3015_s28 = sld [smem:[#allocation16_spill]] }
 0x7b6   : > { %s3016_s29 = sld [smem:[#allocation22_spill]]  ;;  %32 = sbr.rel (!%p30_p10) target bundleno = 22 (0x16), region = 194 }
 0x7b7   : > { %s3017_s0 = sld [smem:[#allocation17_spill]] }
 0x7b8   : > { %s3018_s30 = sld [smem:[#allocation18_spill]]  ;;  %s3022_s25 = smov %s3012_s14 }
 0x7b9   : > { %s3019_s18 = sld [smem:[#allocation20_spill]] }
 0x7ba   : > { %s3020_s19 = sld [smem:[#allocation21_spill]] }
 0x7bb   :  { %1693 = vsyncpa [#allocation8], 1 }
 0x7bc   :  { %1695 = vsyncpa [#allocation8 + $0x1], 1 }
 0x7bd   :  { %1696 = vsyncpa [#allocation9], 1 }
 0x7be   :  { %1698 = vsyncpa [#allocation9 + $0x1], 1 }

</bundles_post_ra>
